<compile_context>
chip_gen: v5e
topology: v5e:2x2
jax: 0.10.0
libtpu: 0.0.40
codegen_flags: <defaults>
</compile_context>

<pallas_src>
import numpy as np
import jax
import jax.numpy as jnp
from jax import lax
from jax.experimental import pallas as pl
from jax.experimental.pallas import tpu as pltpu

TILE = 128          # row/col tile; 128 keeps lane dims dense and VMEM use ~1 MiB
_NEG_BIG = -1e30    # finite "minus infinity" (avoids 0 * inf = NaN)


def _make_kernel(temperature, n_valid, tm, tn):
    inv_temp = float(1.0 / temperature)

    def kernel(lab_i_ref, lab_j_ref, w_i_ref, fi_ref, fj_ref, out_ref,
               m_sc, l_sc, ps_sc, pss_sc):
        i = pl.program_id(0)
        j = pl.program_id(1)

        # -------- init per-row accumulators at the start of the column sweep --------
        @pl.when(j == 0)
        def _init():
            m_sc[...] = jnp.full_like(m_sc, _NEG_BIG)
            l_sc[...] = jnp.zeros_like(l_sc)
            ps_sc[...] = jnp.zeros_like(ps_sc)
            pss_sc[...] = jnp.zeros_like(pss_sc)

        # -------- scores for this [tm, tn] tile (bf16 MXU operands, f32 accumulate) --
        s = lax.dot_general(
            fi_ref[...], fj_ref[...],
            (((1,), (1,)), ((), ())),
            preferred_element_type=jnp.float32,
        ) * inv_temp                                                   # [tm, tn] f32

        # per-tile masks from iotas: exclude diagonal and padded columns
        row_g = i * tm + lax.broadcasted_iota(jnp.int32, (tm, tn), 0)
        col_g = j * tn + lax.broadcasted_iota(jnp.int32, (tm, tn), 1)
        valid = jnp.logical_and(row_g != col_g, col_g < n_valid)

        s = jnp.where(valid, s, _NEG_BIG)

        # positive mask: same label and valid (diag / padding excluded)
        pos = jnp.where(
            jnp.logical_and(lab_i_ref[...] == lab_j_ref[...], valid),
            1.0, 0.0)                                                  # [tm, tn] f32

        # -------- online logsumexp over columns (diag excluded via _NEG_BIG) --------
        m_prev = m_sc[...]
        m_new = jnp.maximum(m_prev, jnp.max(s, axis=1, keepdims=True))
        l_sc[...] = (jnp.exp(m_prev - m_new) * l_sc[...]
                     + jnp.sum(jnp.exp(s - m_new), axis=1, keepdims=True))
        m_sc[...] = m_new

        # exact per-row sums (no rescaling needed: not exponentiated)
        ps_sc[...] = ps_sc[...] + jnp.sum(pos, axis=1, keepdims=True)
        pss_sc[...] = pss_sc[...] + jnp.sum(pos * s, axis=1, keepdims=True)

        # -------- finalize after the last column block ------------------------------
        @pl.when(j == pl.num_programs(1) - 1)
        def _finalize():
            lse = m_sc[...] + jnp.log(l_sc[...])                       # [tm, 1]
            den = ps_sc[...]                                           # [tm, 1]
            num = w_i_ref[...] * (pss_sc[...] - lse * den)             # [tm, 1]
            inv_den = pl.reciprocal(den, approx=True)
            loss_col = jnp.where(den > 0.0, -num * inv_den, jnp.zeros_like(den))
            # lane-dense store: replicate per-anchor loss across 128 lanes
            out_ref[...] = jnp.broadcast_to(loss_col, (tm, 128))

    return kernel


def semi_sup_con_loss(features, input_weights, labels,
                      temperature=0.07, contrast_mode="all"):
    """JAX/Pallas equivalent of SemiSupConLoss.forward(features, input_weights, labels)."""
    features = jnp.asarray(features)
    if features.ndim < 3:
        raise ValueError("`features` needs to be [bsz, n_views, ...]")
    if features.ndim > 3:
        features = features.reshape(features.shape[0], features.shape[1], -1)
    if contrast_mode != "all":
        raise ValueError("only contrast_mode='all' implemented")

    bsz, n_views, d = features.shape
    n = n_views * bsz
    n_pad = ((n + TILE - 1) // TILE) * TILE

    # contrast_feature = torch.cat(torch.unbind(features, dim=1), dim=0)
    cf = jnp.transpose(features, (1, 0, 2)).reshape(n, d).astype(jnp.float32)

    # --- label / weight preprocessing (host-side glue, mirrors the PyTorch .item()) ---
    labels_np = np.asarray(labels).reshape(-1)
    max_label = int(labels_np.max()) if labels_np.shape[0] > 0 else 0
    n_missing = bsz - labels_np.shape[0]
    stream_labels = max_label + np.arange(1, n_missing + 1, dtype=np.int64)
    labels_full = np.concatenate([labels_np.astype(np.int64), stream_labels])   # [bsz]
    labels_tiled = np.tile(labels_full, n_views).astype(np.int32)               # [n]
    w_tiled = np.tile(np.asarray(input_weights, np.float32), n_views)           # [n]

    lab_pad = np.full((n_pad,), -1, np.int32)
    lab_pad[:n] = labels_tiled
    w_pad = np.zeros((n_pad,), np.float32)
    w_pad[:n] = w_tiled

    feat_pad = jnp.zeros((n_pad, d), jnp.bfloat16).at[:n].set(cf.astype(jnp.bfloat16))
    lab_col = jnp.asarray(lab_pad.reshape(n_pad, 1))     # row-block labels
    lab_row = jnp.asarray(lab_pad.reshape(1, n_pad))     # col-block labels (lane-dense)
    w_col = jnp.asarray(w_pad.reshape(n_pad, 1))         # row-block weights

    grid = (n_pad // TILE, n_pad // TILE)
    kernel = _make_kernel(temperature, n_valid=n, tm=TILE, tn=TILE)

    out = pl.pallas_call(
        kernel,
        out_shape=jax.ShapeDtypeStruct((n_pad, 128), jnp.float32),
        grid=grid,
        in_specs=[
            pl.BlockSpec((TILE, 1), lambda i, j: (i, 0)),     # lab_col  (row block)
            pl.BlockSpec((1, TILE), lambda i, j: (0, j)),     # lab_row  (col block)
            pl.BlockSpec((TILE, 1), lambda i, j: (i, 0)),     # weights  (row block)
            pl.BlockSpec((TILE, d), lambda i, j: (i, 0)),     # features (row block)
            pl.BlockSpec((TILE, d), lambda i, j: (j, 0)),     # features (col block)
        ],
        out_specs=pl.BlockSpec((TILE, 128), lambda i, j: (i, 0)),
        scratch_shapes=[pltpu.VMEM((TILE, 1), jnp.float32)] * 4,   # m, l, Σpos, Σpos·s
        compiler_params=pltpu.CompilerParams(
            dimension_semantics=("parallel", "arbitrary")),
    )(lab_col, lab_row, w_col, feat_pad, feat_pad)

    per_anchor = out[:n, 0]          # drop padded rows; lane 0 holds the value
    return jnp.mean(per_anchor)


def _reference_loss(features, input_weights, labels, temperature=0.07):
    """Pure-JAX f32 reference mirroring the PyTorch code (labels path)."""
    features = jnp.asarray(features, jnp.float32)
    bsz, n_views, d = features.shape
    labels_np = np.asarray(labels).reshape(-1)
    max_label = int(labels_np.max()) if labels_np.shape[0] > 0 else 0
    stream = max_label + np.arange(1, bsz - labels_np.shape[0] + 1)
    labels_full = np.concatenate([labels_np, stream]).reshape(-1, 1)
    posmask = (labels_full == labels_full.T).astype(np.float32)
    wposmask = np.broadcast_to(np.asarray(input_weights, np.float32).reshape(-1, 1),
                               (bsz, bsz)).copy()
    cf = jnp.transpose(features, (1, 0, 2)).reshape(n_views * bsz, d)
    adc = (cf @ cf.T) / temperature
    logits = adc - jnp.max(adc, axis=1, keepdims=True)
    wpm = jnp.asarray(np.tile(wposmask, (n_views, n_views)))
    pm = jnp.asarray(np.tile(posmask, (n_views, n_views)))
    nn_ = n_views * bsz
    mask_out = jnp.ones((nn_, nn_)) - jnp.eye(nn_)
    pm = pm * mask_out
    wpm = wpm * pm
    exp_logits = jnp.exp(logits) * mask_out
    log_prob = logits - jnp.log(exp_logits.sum(1, keepdims=True))
    mean_log_prob_pos = (wpm * log_prob).sum(1) / pm.sum(1)
    return jnp.mean(-mean_log_prob_pos)


if __name__ == "__main__":
    # Small but tiling-exercising shapes: memory_batch=64, stream=8 -> bsz=72;
    # n_views=2 -> N=144, padded to 256 -> grid (2, 2) with TILE=128; feature dim D=32.
    bsz, n_views, d = 72, 2, 32
    mbs = 64  # labeled memory samples; the remaining 8 are stream samples

    key = jax.random.PRNGKey(0)
    kf, kl, kw = jax.random.split(key, 3)
    feats = jax.random.normal(kf, (bsz, n_views, d), dtype=jnp.float32)
    feats = feats / jnp.linalg.norm(feats, axis=-1, keepdims=True)   # unit-norm embeddings
    labels = np.asarray(jax.random.randint(kl, (mbs,), 0, 5))
    input_weights = np.asarray(jax.random.uniform(kw, (bsz,), minval=0.2, maxval=1.0))

    loss = semi_sup_con_loss(feats, input_weights, labels, temperature=0.07)
    loss = jax.block_until_ready(loss)

    ref = _reference_loss(feats, input_weights, labels, temperature=0.07)
    # bf16 MXU operands + approx reciprocal => slightly looser tolerance than pure f32.
    assert np.allclose(np.asarray(loss), np.asarray(ref), rtol=5e-2, atol=5e-2), (loss, ref)

    print("KERNEL_OK")
</pallas_src>

<mosaic_0001>
module attributes {stable_mosaic.version = 11 : i64} {
  func.func @kernel(%arg0: i32, %arg1: i32, %arg2: memref<128x1xi32, #tpu.memory_space<vmem>>, %arg3: memref<1x128xi32, #tpu.memory_space<vmem>>, %arg4: memref<128x1xf32, #tpu.memory_space<vmem>>, %arg5: memref<128x32xbf16, #tpu.memory_space<vmem>>, %arg6: memref<128x32xbf16, #tpu.memory_space<vmem>>, %arg7: memref<128x128xf32, #tpu.memory_space<vmem>>, %arg8: memref<128x1xf32, #tpu.memory_space<vmem>>, %arg9: memref<128x1xf32, #tpu.memory_space<vmem>>, %arg10: memref<128x1xf32, #tpu.memory_space<vmem>>, %arg11: memref<128x1xf32, #tpu.memory_space<vmem>>) attributes {dimension_semantics = [#tpu.dimension_semantics<parallel>, #tpu.dimension_semantics<arbitrary>], iteration_bounds = array<i64: 2, 2>, scalar_prefetch = 0 : i64, scratch_operands = 4 : i64, tpu.core_type = #tpu.core_type<tc>, window_params = [{transform_indices = @transform_0, window_bounds = array<i64: 128, 1>}, {transform_indices = @transform_1, window_bounds = array<i64: 1, 128>}, {transform_indices = @transform_2, window_bounds = array<i64: 128, 1>}, {transform_indices = @transform_3, window_bounds = array<i64: 128, 32>}, {transform_indices = @transform_4, window_bounds = array<i64: 128, 32>}, {transform_indices = @transform_5, window_bounds = array<i64: 128, 128>}]} {
    %c0_i32 = arith.constant 0 : i32
    %0 = arith.cmpi eq, %arg1, %c0_i32 : i32
    %1 = arith.extui %0 : i1 to i32
    %c0_i32_0 = arith.constant 0 : i32
    %2 = arith.cmpi ne, %1, %c0_i32_0 : i32
    scf.if %2 {
      %cst_34 = arith.constant -1.000000e+30 : f32
      %61 = vector.broadcast %cst_34 : f32 to vector<128x1xf32>
      %c0_35 = arith.constant 0 : index
      %c0_36 = arith.constant 0 : index
      %62 = vector.load %arg8[%c0_35, %c0_36] : memref<128x1xf32, #tpu.memory_space<vmem>>, vector<128x1xf32>
      tpu.vector_store %arg8[%c0_35, %c0_36], %61 {strides = array<i32>} : memref<128x1xf32, #tpu.memory_space<vmem>>, vector<128x1xf32>,
      %cst_37 = arith.constant 0.000000e+00 : f32
      %63 = vector.broadcast %cst_37 : f32 to vector<128x1xf32>
      %c0_38 = arith.constant 0 : index
      %c0_39 = arith.constant 0 : index
      %64 = vector.load %arg9[%c0_38, %c0_39] : memref<128x1xf32, #tpu.memory_space<vmem>>, vector<128x1xf32>
      tpu.vector_store %arg9[%c0_38, %c0_39], %63 {strides = array<i32>} : memref<128x1xf32, #tpu.memory_space<vmem>>, vector<128x1xf32>,
      %cst_40 = arith.constant 0.000000e+00 : f32
      %65 = vector.broadcast %cst_40 : f32 to vector<128x1xf32>
      %c0_41 = arith.constant 0 : index
      %c0_42 = arith.constant 0 : index
      %66 = vector.load %arg10[%c0_41, %c0_42] : memref<128x1xf32, #tpu.memory_space<vmem>>, vector<128x1xf32>
      tpu.vector_store %arg10[%c0_41, %c0_42], %65 {strides = array<i32>} : memref<128x1xf32, #tpu.memory_space<vmem>>, vector<128x1xf32>,
      %cst_43 = arith.constant 0.000000e+00 : f32
      %67 = vector.broadcast %cst_43 : f32 to vector<128x1xf32>
      %c0_44 = arith.constant 0 : index
      %c0_45 = arith.constant 0 : index
      %68 = vector.load %arg11[%c0_44, %c0_45] : memref<128x1xf32, #tpu.memory_space<vmem>>, vector<128x1xf32>
      tpu.vector_store %arg11[%c0_44, %c0_45], %67 {strides = array<i32>} : memref<128x1xf32, #tpu.memory_space<vmem>>, vector<128x1xf32>,
    } else {
    }
    %c0 = arith.constant 0 : index
    %c0_1 = arith.constant 0 : index
    %3 = vector.load %arg5[%c0, %c0_1] : memref<128x32xbf16, #tpu.memory_space<vmem>>, vector<128x32xbf16>
    %c0_2 = arith.constant 0 : index
    %c0_3 = arith.constant 0 : index
    %4 = vector.load %arg6[%c0_2, %c0_3] : memref<128x32xbf16, #tpu.memory_space<vmem>>, vector<128x32xbf16>
    %cst = arith.constant dense<0.000000e+00> : vector<128x128xf32>
    %5 = tpu.matmul %3, %4, %cst {dimension_numbers = #tpu.dot_dimension_numbers<[1], [1], [0], [0], [0, 0, 1, 0], [], []>} : vector<128x32xbf16>, vector<128x32xbf16>, vector<128x128xf32> -> vector<128x128xf32>
    %cst_4 = arith.constant 14.2857141 : f32
    %6 = vector.broadcast %cst_4 : f32 to vector<128x128xf32>
    %7 = arith.mulf %5, %6 : vector<128x128xf32>
    %c128_i32 = arith.constant 128 : i32
    %8 = arith.muli %arg0, %c128_i32 : i32
    %9 = tpu.iota {dimensions = array<i32: 0>} : vector<128x128xi32>
    %10 = vector.broadcast %8 : i32 to vector<128x128xi32>
    %11 = arith.addi %10, %9 : vector<128x128xi32>
    %c128_i32_5 = arith.constant 128 : i32
    %12 = arith.muli %arg1, %c128_i32_5 : i32
    %13 = tpu.iota {dimensions = array<i32: 1>} : vector<128x128xi32>
    %14 = vector.broadcast %12 : i32 to vector<128x128xi32>
    %15 = arith.addi %14, %13 : vector<128x128xi32>
    %16 = arith.cmpi ne, %11, %15 : vector<128x128xi32>
    %c144_i32 = arith.constant 144 : i32
    %17 = vector.broadcast %c144_i32 : i32 to vector<128x128xi32>
    %18 = arith.cmpi slt, %15, %17 : vector<128x128xi32>
    %19 = arith.andi %16, %18 : vector<128x128xi1>
    %cst_6 = arith.constant -1.000000e+30 : f32
    %20 = vector.broadcast %cst_6 : f32 to vector<128x128xf32>
    %21 = arith.select %19, %7, %20 : vector<128x128xi1>, vector<128x128xf32>
    %c0_7 = arith.constant 0 : index
    %c0_8 = arith.constant 0 : index
    %22 = vector.load %arg2[%c0_7, %c0_8] : memref<128x1xi32, #tpu.memory_space<vmem>>, vector<128x1xi32>
    %c0_9 = arith.constant 0 : index
    %c0_10 = arith.constant 0 : index
    %23 = vector.load %arg3[%c0_9, %c0_10] : memref<1x128xi32, #tpu.memory_space<vmem>>, vector<1x128xi32>
    %24 = vector.broadcast %22 : vector<128x1xi32> to vector<128x128xi32>
    %25 = vector.broadcast %23 : vector<1x128xi32> to vector<128x128xi32>
    %26 = arith.cmpi eq, %24, %25 : vector<128x128xi32>
    %27 = arith.andi %26, %19 : vector<128x128xi1>
    %cst_11 = arith.constant 1.000000e+00 : f32
    %cst_12 = arith.constant 0.000000e+00 : f32
    %28 = vector.broadcast %cst_11 : f32 to vector<128x128xf32>
    %29 = vector.broadcast %cst_12 : f32 to vector<128x128xf32>
    %30 = arith.select %27, %28, %29 : vector<128x128xi1>, vector<128x128xf32>
    %c0_13 = arith.constant 0 : index
    %c0_14 = arith.constant 0 : index
    %31 = vector.load %arg8[%c0_13, %c0_14] : memref<128x1xf32, #tpu.memory_space<vmem>>, vector<128x1xf32>
    %cst_15 = arith.constant dense<0xFF800000> : vector<128xf32>
    %32 = vector.multi_reduction <maximumf>, %21, %cst_15 [1] : vector<128x128xf32> to vector<128xf32>
    %33 = vector.shape_cast %32 : vector<128xf32> to vector<128x1xf32>
    %34 = arith.maximumf %31, %33 : vector<128x1xf32>
    %35 = arith.subf %31, %34 : vector<128x1xf32>
    %36 = math.exp %35 : vector<128x1xf32>
    %c0_16 = arith.constant 0 : index
    %c0_17 = arith.constant 0 : index
    %37 = vector.load %arg9[%c0_16, %c0_17] : memref<128x1xf32, #tpu.memory_space<vmem>>, vector<128x1xf32>
    %38 = arith.mulf %36, %37 : vector<128x1xf32>
    %39 = vector.broadcast %34 : vector<128x1xf32> to vector<128x128xf32>
    %40 = arith.subf %21, %39 : vector<128x128xf32>
    %41 = math.exp %40 : vector<128x128xf32>
    %cst_18 = arith.constant dense<0.000000e+00> : vector<128xf32>
    %42 = vector.multi_reduction <add>, %41, %cst_18 [1] : vector<128x128xf32> to vector<128xf32>
    %43 = vector.shape_cast %42 : vector<128xf32> to vector<128x1xf32>
    %44 = arith.addf %38, %43 : vector<128x1xf32>
    %c0_19 = arith.constant 0 : index
    %c0_20 = arith.constant 0 : index
    %45 = vector.load %arg9[%c0_19, %c0_20] : memref<128x1xf32, #tpu.memory_space<vmem>>, vector<128x1xf32>
    tpu.vector_store %arg9[%c0_19, %c0_20], %44 {strides = array<i32>} : memref<128x1xf32, #tpu.memory_space<vmem>>, vector<128x1xf32>,
    %c0_21 = arith.constant 0 : index
    %c0_22 = arith.constant 0 : index
    %46 = vector.load %arg8[%c0_21, %c0_22] : memref<128x1xf32, #tpu.memory_space<vmem>>, vector<128x1xf32>
    tpu.vector_store %arg8[%c0_21, %c0_22], %34 {strides = array<i32>} : memref<128x1xf32, #tpu.memory_space<vmem>>, vector<128x1xf32>,
    %c0_23 = arith.constant 0 : index
    %c0_24 = arith.constant 0 : index
    %47 = vector.load %arg10[%c0_23, %c0_24] : memref<128x1xf32, #tpu.memory_space<vmem>>, vector<128x1xf32>
    %cst_25 = arith.constant dense<0.000000e+00> : vector<128xf32>
    %48 = vector.multi_reduction <add>, %30, %cst_25 [1] : vector<128x128xf32> to vector<128xf32>
    %49 = vector.shape_cast %48 : vector<128xf32> to vector<128x1xf32>
    %50 = arith.addf %47, %49 : vector<128x1xf32>
    %c0_26 = arith.constant 0 : index
    %c0_27 = arith.constant 0 : index
    %51 = vector.load %arg10[%c0_26, %c0_27] : memref<128x1xf32, #tpu.memory_space<vmem>>, vector<128x1xf32>
    tpu.vector_store %arg10[%c0_26, %c0_27], %50 {strides = array<i32>} : memref<128x1xf32, #tpu.memory_space<vmem>>, vector<128x1xf32>,
    %c0_28 = arith.constant 0 : index
    %c0_29 = arith.constant 0 : index
    %52 = vector.load %arg11[%c0_28, %c0_29] : memref<128x1xf32, #tpu.memory_space<vmem>>, vector<128x1xf32>
    %53 = arith.mulf %30, %21 : vector<128x128xf32>
    %cst_30 = arith.constant dense<0.000000e+00> : vector<128xf32>
    %54 = vector.multi_reduction <add>, %53, %cst_30 [1] : vector<128x128xf32> to vector<128xf32>
    %55 = vector.shape_cast %54 : vector<128xf32> to vector<128x1xf32>
    %56 = arith.addf %52, %55 : vector<128x1xf32>
    %c0_31 = arith.constant 0 : index
    %c0_32 = arith.constant 0 : index
    %57 = vector.load %arg11[%c0_31, %c0_32] : memref<128x1xf32, #tpu.memory_space<vmem>>, vector<128x1xf32>
    tpu.vector_store %arg11[%c0_31, %c0_32], %56 {strides = array<i32>} : memref<128x1xf32, #tpu.memory_space<vmem>>, vector<128x1xf32>,
    %c1_i32 = arith.constant 1 : i32
    %58 = arith.cmpi eq, %arg1, %c1_i32 : i32
    %59 = arith.extui %58 : i1 to i32
    %c0_i32_33 = arith.constant 0 : i32
    %60 = arith.cmpi ne, %59, %c0_i32_33 : i32
    scf.if %60 {
      %c0_34 = arith.constant 0 : index
      %c0_35 = arith.constant 0 : index
      %61 = vector.load %arg8[%c0_34, %c0_35] : memref<128x1xf32, #tpu.memory_space<vmem>>, vector<128x1xf32>
      %c0_36 = arith.constant 0 : index
      %c0_37 = arith.constant 0 : index
      %62 = vector.load %arg9[%c0_36, %c0_37] : memref<128x1xf32, #tpu.memory_space<vmem>>, vector<128x1xf32>
      %63 = math.log %62 : vector<128x1xf32>
      %64 = arith.addf %61, %63 : vector<128x1xf32>
      %c0_38 = arith.constant 0 : index
      %c0_39 = arith.constant 0 : index
      %65 = vector.load %arg10[%c0_38, %c0_39] : memref<128x1xf32, #tpu.memory_space<vmem>>, vector<128x1xf32>
      %c0_40 = arith.constant 0 : index
      %c0_41 = arith.constant 0 : index
      %66 = vector.load %arg4[%c0_40, %c0_41] : memref<128x1xf32, #tpu.memory_space<vmem>>, vector<128x1xf32>
      %c0_42 = arith.constant 0 : index
      %c0_43 = arith.constant 0 : index
      %67 = vector.load %arg11[%c0_42, %c0_43] : memref<128x1xf32, #tpu.memory_space<vmem>>, vector<128x1xf32>
      %68 = arith.mulf %64, %65 : vector<128x1xf32>
      %69 = arith.subf %67, %68 : vector<128x1xf32>
      %70 = arith.mulf %66, %69 : vector<128x1xf32>
      %71 = tpu.reciprocal %65 {approx = true} : vector<128x1xf32> -> vector<128x1xf32>
      %cst_44 = arith.constant 0.000000e+00 : f32
      %72 = vector.broadcast %cst_44 : f32 to vector<128x1xf32>
      %73 = arith.cmpf ogt, %65, %72 : vector<128x1xf32>
      %cst_45 = arith.constant 0.000000e+00 : f32
      %74 = vector.broadcast %cst_45 : f32 to vector<128x1xf32>
      %75 = arith.subf %74, %70 : vector<128x1xf32>
      %76 = arith.mulf %75, %71 : vector<128x1xf32>
      %cst_46 = arith.constant 0.000000e+00 : f32
      %77 = vector.broadcast %cst_46 : f32 to vector<128x1xf32>
      %78 = arith.select %73, %76, %77 : vector<128x1xi1>, vector<128x1xf32>
      %79 = vector.shape_cast %78 : vector<128x1xf32> to vector<128x1xf32>
      %80 = vector.broadcast %79 : vector<128x1xf32> to vector<128x128xf32>
      %c0_47 = arith.constant 0 : index
      %c0_48 = arith.constant 0 : index
      %81 = vector.load %arg7[%c0_47, %c0_48] : memref<128x128xf32, #tpu.memory_space<vmem>>, vector<128x128xf32>
      tpu.vector_store %arg7[%c0_47, %c0_48], %80 {strides = array<i32>} : memref<128x128xf32, #tpu.memory_space<vmem>>, vector<128x128xf32>,
    } else {
    }
    return
  }
  func.func @transform_0(%arg0: i32, %arg1: i32) -> (i32, i32) {
    %c0_i32 = arith.constant 0 : i32
    %c0_i32_0 = arith.constant 0 : i32
    return %arg0, %c0_i32 : i32, i32
  }
  func.func @transform_1(%arg0: i32, %arg1: i32) -> (i32, i32) {
    %c0_i32 = arith.constant 0 : i32
    %c0_i32_0 = arith.constant 0 : i32
    return %c0_i32, %arg1 : i32, i32
  }
  func.func @transform_2(%arg0: i32, %arg1: i32) -> (i32, i32) {
    %c0_i32 = arith.constant 0 : i32
    %c0_i32_0 = arith.constant 0 : i32
    return %arg0, %c0_i32 : i32, i32
  }
  func.func @transform_3(%arg0: i32, %arg1: i32) -> (i32, i32) {
    %c0_i32 = arith.constant 0 : i32
    %c0_i32_0 = arith.constant 0 : i32
    return %arg0, %c0_i32 : i32, i32
  }
  func.func @transform_4(%arg0: i32, %arg1: i32) -> (i32, i32) {
    %c0_i32 = arith.constant 0 : i32
    %c0_i32_0 = arith.constant 0 : i32
    return %arg1, %c0_i32 : i32, i32
  }
  func.func @transform_5(%arg0: i32, %arg1: i32) -> (i32, i32) {
    %c0_i32 = arith.constant 0 : i32
    %c0_i32_0 = arith.constant 0 : i32
    return %arg0, %c0_i32 : i32, i32
  }
}

</mosaic_0001>

<bundles_post_ra>
// kernel: tpu_custom_call.1
= control target key start
LH: loop header
LB: loop body
LE: loop exit
PB: predicated region body
PF: predicated region fallthrough
CT: control target
= control target key end

     0   :  { %s3364_s0 = inlined_call_operand.vmem [shape: s32[256,1], index: 0, kind: input, shape index: {}]   ;;  %s3365_s1 = inlined_call_operand.vmem [shape: s32[1,256], index: 1, kind: input, shape index: {}]   ;;  %s3366_s2 = inlined_call_operand.vmem [shape: f32[256,1], index: 2, kind: input, shape index: {}]   ;;  %s3367_s3 = inlined_call_operand.vmem [shape: bf16[256,32], index: 3, kind: input, shape index: {}]   ;;  %s3368_s4 = inlined_call_operand.vmem [shape: bf16[256,32], index: 4, kind: input, shape index: {}]   ;;  %s3369_s5 = inlined_call_operand.hbm [shape: f32[256,128], index: 5, kind: output, shape index: {}]  }
   0x1   :  { %3384 = sst [smem:[#allocation16_spill]] %s3364_s0 }
   0x2   :  { %10 = vsyncpa [#allocation7], 0 }
   0x3   :  { %12 = vsyncpa [#allocation7 + $0x1], 0  ;;  %s2317_s18 = smov 0   ;;  %s2319_s19 = smov 0  }
   0x4   :  { %s2321_s20 = smov 0   ;;  %s2323_s21 = smov 0  }
   0x5   :  { %s2325_s22 = smov 0   ;;  %s2327_s23 = smov 0  }
   0x6   :  { %s2329_s24 = smov 0   ;;  %s2331_s25 = smov 0  }
   0x7 LB: > { %3385 = sst [smem:[#allocation9_spill]] %s2258_s20  ;;  %s1835_s26 = sadd.s32 4294967295, %s2278_s25   ;;  %s2278_s25 = sphi %s2331_s25, %s18_s25   ;;  %s2274_s24 = sphi %s2329_s24, %s3465_s24   ;;  %s2270_s23 = sphi %s2327_s23, %s3469_s23   ;;  %s2266_s22 = sphi %s2325_s22, %s3463_s22   ;;  %s2262_s21 = sphi %s2323_s21, %s3462_s21   ;;  %s2258_s20 = sphi %s2321_s20, %s3468_s20   ;;  %s2254_s19 = sphi %s2319_s19, %s3467_s19   ;;  %s2250_s18 = sphi %s2317_s18, %s3466_s18  }
   0x8   : > { %3386 = sst [smem:[#allocation10_spill]] %s2270_s23  ;;  %s1836_s27 = sadd.s32 4294967294, %s2278_s25  }
   0x9   : > { %3387 = sst [smem:[#allocation11_spill]] %s2274_s24  ;;  %s27_s28 = sadd.s32 1, %s2270_s23 }
   0xa   : > { %p28_p0 = scmp.ge.s32.totalorder %s27_s28, 2  ;;  %s30_s29 = sadd.s32 1, %s2274_s24 }
   0xb   : > { %p177_p1 = scmp.ne.s32.totalorder %s2258_s20, %s2254_s19  ;;  %p178_p2 = scmp.eq.s32.totalorder %s1835_s26, 3 }
   0xc   : > { %s3471_s28 = smov (%p28_p0, %s27_s28), 0  ;;  %s3473_s29 = smov (!%p28_p0, %s30_s29), %s2274_s24 }
   0xd   : > { %3388 = sst [smem:[#allocation12_spill]] %s3471_s28  ;;  %p2366_p3 = por %p178_p2, %p177_p1 }
   0xe   : > { %p183_p4 = scmp.ne.s32.totalorder %s2254_s19, %s2250_s18  ;;  %p32_p5 = scmp.ge.s32.totalorder %s3473_s29, 2 }
   0xf   : > { %p184_p6 = scmp.eq.s32.totalorder %s1836_s27, 3  ;;  %p1839_p7 = scmp.ge.s32.totalorder %s2278_s25, 1 }
  0x10   : > { %p244_p8 = scmp.lt.s32.totalorder %s2278_s25, 5  ;;  %s3475_s29 = smov (%p32_p5, %s3473_s29), 0 }
  0x11   : > { %3390 = sst [smem:[#allocation13_spill]] %s3475_s29  ;;  %p2376_p9 = por %p184_p6, %p183_p4 }
  0x12   : > { %p245_p10 = pnand %p1839_p7, %p244_p8  ;;  %s164_s7 = ssub.s32 %s2274_s24, %s3475_s29 }
  0x13   : > { %s167_s8 = sadd.s32 1, %s2258_s20  ;;  %p165_p11 = scmp.eq.s32.totalorder %s164_s7, 0 }
  0x14   : > { %248 = sbr.rel (%p245_p10) target bundleno = 940 (0x3ac), region = 40 }
  0x15   : > { %s2384_s9 = scalar_select %p165_p11, %s2258_s20, %s167_s8  }
  0x17   : > { %3392 = sst [smem:[#allocation14_spill]] %s2384_s9 }
  0x19   : > { %s3371_s10 = sand.u32 1, %s2254_s19   ;;  %s1841_s11 = sshll.u32 %s2266_s22, 4 }
  0x1a   : > { %s1840_s12 = sshll.u32 %s3371_s10, 7  ;;  %p291_p12 = scmp.lt.s32.totalorder %s1841_s11, 31 }
  0x1b   : > { %p296_p13 = scmp.lt.s32.totalorder %s2262_s21, 1  ;;  %s3393_s0 = sld [smem:[#allocation16_spill]] }
  0x1c   : > { %s3477_s11 = smov (!%p291_p12, %s1841_s11), 31  ;;  %s2419_s27 = scalar_lea.vmem [#allocation6], %s1840_s12 }
  0x1d   : > { %s2392_s13 = scalar_select %p296_p13, %s2262_s21, 1 }
  0x1e   : > { %s1842_s14 = sshll.u32 %s3477_s11, 3  ;;  %s1846_s15 = sshll.u32 %s3477_s11, 2 }
  0x1f   : > { %s298_s8 = scalar_lea.vmem %s3365_s1, %s2392_s13  ;;  %s2406_s10 = scalar_lea.vmem %s3366_s2, %s1842_s14 }
  0x20   : > { %s2411_s9 = scalar_lea.vmem %s3367_s3, %s1846_s15  ;;  %s1847_s11 = sshll.u32 %s2262_s21, 4 }
  0x21   : > { %s2397_s26 = scalar_lea.vmem %s3393_s0, %s1842_s14  ;;  %p312_p0 = scmp.lt.s32.totalorder %s1847_s11, 31 }
  0x22   : > { %p1849_p1 = scmp.ne.s32.totalorder %s2262_s21, 0 }
  0x23   : > { %s3479_s11 = smov (!%p312_p0, %s1847_s11), 31 }
  0x24   : > { %s1848_s16 = sshll.u32 %s3479_s11, 2  ;;  %321 = sbr.rel (%p1849_p1) target bundleno = 106 (0x6a), region = 44 }
  0x25   : > { %s2417_s20 = scalar_lea.vmem %s3368_s4, %s1848_s16 }
  0x29   : > { %vm322_vm0 = vcmask 7168   ;;  %v2280_v0 = vmov -1e+30   ;;  %v2281_v1 = vmov 0.0  }
  0x2a   : > { %323 = vst.msk [vmem:[#allocation2] sm:$0xff] %vm322_vm0, %v2280_v0 }
  0x2b   : > { %324 = vst.msk [vmem:[#allocation2 + $0x8] sm:$0xff] %vm322_vm0, %v2280_v0 }
  0x2c   : > { %325 = vst.msk [vmem:[#allocation2 + $0x10] sm:$0xff] %vm322_vm0, %v2280_v0 }
  0x2d   : > { %326 = vst.msk [vmem:[#allocation2 + $0x18] sm:$0xff] %vm322_vm0, %v2280_v0 }
  0x2e   : > { %327 = vst.msk [vmem:[#allocation2 + $0x20] sm:$0xff] %vm322_vm0, %v2280_v0 }
  0x2f   : > { %328 = vst.msk [vmem:[#allocation2 + $0x28] sm:$0xff] %vm322_vm0, %v2280_v0 }
  0x30   : > { %329 = vst.msk [vmem:[#allocation2 + $0x30] sm:$0xff] %vm322_vm0, %v2280_v0 }
  0x31   : > { %330 = vst.msk [vmem:[#allocation2 + $0x38] sm:$0xff] %vm322_vm0, %v2280_v0 }
  0x32   : > { %331 = vst.msk [vmem:[#allocation2 + $0x40] sm:$0xff] %vm322_vm0, %v2280_v0 }
  0x33   : > { %332 = vst.msk [vmem:[#allocation2 + $0x48] sm:$0xff] %vm322_vm0, %v2280_v0 }
  0x34   : > { %333 = vst.msk [vmem:[#allocation2 + $0x50] sm:$0xff] %vm322_vm0, %v2280_v0 }
  0x35   : > { %334 = vst.msk [vmem:[#allocation2 + $0x58] sm:$0xff] %vm322_vm0, %v2280_v0 }
  0x36   : > { %335 = vst.msk [vmem:[#allocation2 + $0x60] sm:$0xff] %vm322_vm0, %v2280_v0 }
  0x37   : > { %336 = vst.msk [vmem:[#allocation2 + $0x68] sm:$0xff] %vm322_vm0, %v2280_v0 }
  0x38   : > { %337 = vst.msk [vmem:[#allocation2 + $0x70] sm:$0xff] %vm322_vm0, %v2280_v0 }
  0x39   : > { %338 = vst.msk [vmem:[#allocation2 + $0x78] sm:$0xff] %vm322_vm0, %v2280_v0 }
  0x3a   : > { %339 = vst.msk [vmem:[#allocation3] sm:$0xff] %vm322_vm0, %v2281_v1 }
  0x3b   : > { %340 = vst.msk [vmem:[#allocation3 + $0x8] sm:$0xff] %vm322_vm0, %v2281_v1 }
  0x3c   : > { %341 = vst.msk [vmem:[#allocation3 + $0x10] sm:$0xff] %vm322_vm0, %v2281_v1 }
  0x3d   : > { %342 = vst.msk [vmem:[#allocation3 + $0x18] sm:$0xff] %vm322_vm0, %v2281_v1 }
  0x3e   : > { %343 = vst.msk [vmem:[#allocation3 + $0x20] sm:$0xff] %vm322_vm0, %v2281_v1 }
  0x3f   : > { %344 = vst.msk [vmem:[#allocation3 + $0x28] sm:$0xff] %vm322_vm0, %v2281_v1 }
  0x40   : > { %345 = vst.msk [vmem:[#allocation3 + $0x30] sm:$0xff] %vm322_vm0, %v2281_v1 }
  0x41   : > { %346 = vst.msk [vmem:[#allocation3 + $0x38] sm:$0xff] %vm322_vm0, %v2281_v1 }
  0x42   : > { %347 = vst.msk [vmem:[#allocation3 + $0x40] sm:$0xff] %vm322_vm0, %v2281_v1 }
  0x43   : > { %348 = vst.msk [vmem:[#allocation3 + $0x48] sm:$0xff] %vm322_vm0, %v2281_v1 }
  0x44   : > { %349 = vst.msk [vmem:[#allocation3 + $0x50] sm:$0xff] %vm322_vm0, %v2281_v1 }
  0x45   : > { %350 = vst.msk [vmem:[#allocation3 + $0x58] sm:$0xff] %vm322_vm0, %v2281_v1 }
  0x46   : > { %351 = vst.msk [vmem:[#allocation3 + $0x60] sm:$0xff] %vm322_vm0, %v2281_v1 }
  0x47   : > { %352 = vst.msk [vmem:[#allocation3 + $0x68] sm:$0xff] %vm322_vm0, %v2281_v1 }
  0x48   : > { %353 = vst.msk [vmem:[#allocation3 + $0x70] sm:$0xff] %vm322_vm0, %v2281_v1 }
  0x49   : > { %354 = vst.msk [vmem:[#allocation3 + $0x78] sm:$0xff] %vm322_vm0, %v2281_v1 }
  0x4a   : > { %355 = vst.msk [vmem:[#allocation4] sm:$0xff] %vm322_vm0, %v2281_v1 }
  0x4b   : > { %356 = vst.msk [vmem:[#allocation4 + $0x8] sm:$0xff] %vm322_vm0, %v2281_v1 }
  0x4c   : > { %357 = vst.msk [vmem:[#allocation4 + $0x10] sm:$0xff] %vm322_vm0, %v2281_v1 }
  0x4d   : > { %358 = vst.msk [vmem:[#allocation4 + $0x18] sm:$0xff] %vm322_vm0, %v2281_v1 }
  0x4e   : > { %359 = vst.msk [vmem:[#allocation4 + $0x20] sm:$0xff] %vm322_vm0, %v2281_v1 }
  0x4f   : > { %360 = vst.msk [vmem:[#allocation4 + $0x28] sm:$0xff] %vm322_vm0, %v2281_v1 }
  0x50   : > { %361 = vst.msk [vmem:[#allocation4 + $0x30] sm:$0xff] %vm322_vm0, %v2281_v1 }
  0x51   : > { %362 = vst.msk [vmem:[#allocation4 + $0x38] sm:$0xff] %vm322_vm0, %v2281_v1 }
  0x52   : > { %363 = vst.msk [vmem:[#allocation4 + $0x40] sm:$0xff] %vm322_vm0, %v2281_v1 }
  0x53   : > { %364 = vst.msk [vmem:[#allocation4 + $0x48] sm:$0xff] %vm322_vm0, %v2281_v1 }
  0x54   : > { %365 = vst.msk [vmem:[#allocation4 + $0x50] sm:$0xff] %vm322_vm0, %v2281_v1 }
  0x55   : > { %366 = vst.msk [vmem:[#allocation4 + $0x58] sm:$0xff] %vm322_vm0, %v2281_v1 }
  0x56   : > { %367 = vst.msk [vmem:[#allocation4 + $0x60] sm:$0xff] %vm322_vm0, %v2281_v1 }
  0x57   : > { %368 = vst.msk [vmem:[#allocation4 + $0x68] sm:$0xff] %vm322_vm0, %v2281_v1 }
  0x58   : > { %369 = vst.msk [vmem:[#allocation4 + $0x70] sm:$0xff] %vm322_vm0, %v2281_v1 }
  0x59   : > { %370 = vst.msk [vmem:[#allocation4 + $0x78] sm:$0xff] %vm322_vm0, %v2281_v1 }
  0x5a   : > { %371 = vst.msk [vmem:[#allocation5] sm:$0xff] %vm322_vm0, %v2281_v1 }
  0x5b   : > { %372 = vst.msk [vmem:[#allocation5 + $0x8] sm:$0xff] %vm322_vm0, %v2281_v1 }
  0x5c   : > { %373 = vst.msk [vmem:[#allocation5 + $0x10] sm:$0xff] %vm322_vm0, %v2281_v1 }
  0x5d   : > { %374 = vst.msk [vmem:[#allocation5 + $0x18] sm:$0xff] %vm322_vm0, %v2281_v1 }
  0x5e   : > { %375 = vst.msk [vmem:[#allocation5 + $0x20] sm:$0xff] %vm322_vm0, %v2281_v1 }
  0x5f   : > { %376 = vst.msk [vmem:[#allocation5 + $0x28] sm:$0xff] %vm322_vm0, %v2281_v1 }
  0x60   : > { %377 = vst.msk [vmem:[#allocation5 + $0x30] sm:$0xff] %vm322_vm0, %v2281_v1 }
  0x61   : > { %378 = vst.msk [vmem:[#allocation5 + $0x38] sm:$0xff] %vm322_vm0, %v2281_v1 }
  0x62   : > { %379 = vst.msk [vmem:[#allocation5 + $0x40] sm:$0xff] %vm322_vm0, %v2281_v1 }
  0x63   : > { %380 = vst.msk [vmem:[#allocation5 + $0x48] sm:$0xff] %vm322_vm0, %v2281_v1 }
  0x64   : > { %381 = vst.msk [vmem:[#allocation5 + $0x50] sm:$0xff] %vm322_vm0, %v2281_v1 }
  0x65   : > { %382 = vst.msk [vmem:[#allocation5 + $0x58] sm:$0xff] %vm322_vm0, %v2281_v1 }
  0x66   : > { %383 = vst.msk [vmem:[#allocation5 + $0x60] sm:$0xff] %vm322_vm0, %v2281_v1 }
  0x67   : > { %384 = vst.msk [vmem:[#allocation5 + $0x68] sm:$0xff] %vm322_vm0, %v2281_v1 }
  0x68   : > { %385 = vst.msk [vmem:[#allocation5 + $0x70] sm:$0xff] %vm322_vm0, %v2281_v1 }
  0x69   : > { %386 = vst.msk [vmem:[#allocation5 + $0x78] sm:$0xff] %vm322_vm0, %v2281_v1 }
  0x6a PF: > { %v704_v2 = vld [vmem:[%s2397_s26 + $0x10] sm:$0xff]  ;;  %v702_v3 = vld [vmem:[%s2397_s26] sm:$0xff]  ;;  %v1945_v4 = vld [vmem:[%s2417_s20 + $0x38] sm:$0xff]  ;;  %vm499_vm1 = vcmask 261120   ;;  %v2282_v5 = vmov 0   ;;  %v614_v43 = vlaneseq  ;;  %s1922_s0 = sshll.u32 %s2266_s22, 7 }
  0x6b   : > { %2050 = vset.pattern.permute.xlu1 %v2282_v5  ;;  %2049 = vset.pattern.permute.xlu0 %v2282_v5  ;;  %v546_v6 = vsel %vm499_vm1, %v1945_v4, 0  ;;  %v1944_v7 = vld [vmem:[%s2417_s20 + $0x30] sm:$0xff]  ;;  %v706_v8 = vld [vmem:[%s2397_s26 + $0x20] sm:$0xff]  ;;  %v705_v9 = vld [vmem:[%s2397_s26 + $0x18] sm:$0xff]  ;;  %v2542_v47 = vstv %s1922_s0  ;;  %v3396_v1 = vmov 0  ;;  %v2283_v4 = vmov 0.0  }
  0x6c   : > { %726 = vperm.xlu1 %2050, %v704_v2   ;;  %720 = vperm.xlu0 %2049, %v702_v3   ;;  %v703_v10 = vld [vmem:[%s2397_s26 + $0x8] sm:$0xff]  ;;  %v543_v11 = vsel %vm499_vm1, %v1944_v7, 0  ;;  %v708_v14 = vld [vmem:[%s2397_s26 + $0x30] sm:$0xff]  ;;  %v709_v15 = vld [vmem:[%s2397_s26 + $0x38] sm:$0xff]  ;;  %v2538_v45 = vshrl.u32 %v614_v43, 7  ;;  %v650_v46 = vand.u32 127, %v614_v43 }
  0x6d   : > { %548 = vmatpush.bf16.xpose.msra.mxu0 %v546_v6  ;;  %1947 = vmatpush.bf16.xpose.msra.mxu1 %v546_v6  ;;  %v707_v12 = vld [vmem:[%s2397_s26 + $0x28] sm:$0xff]  ;;  %v710_v17 = vld [vmem:[%s2397_s26 + $0x40] sm:$0xff]  ;;  %v712_v20 = vld [vmem:[%s2397_s26 + $0x50] sm:$0xff]  ;;  %p1924_p2 = scmp.ne.s32.totalorder %s2262_s21, 1 }
  0x6e   : > { %1948 = vmatpush.bf16.xpose.msra.mxu2 %v546_v6  ;;  %1949 = vmatpush.bf16.xpose.msra.mxu3 %v546_v6  ;;  %v1943_v13 = vld [vmem:[%s2417_s20 + $0x28] sm:$0xff]  ;;  %v1942_v18 = vld [vmem:[%s2417_s20 + $0x20] sm:$0xff]  ;;  %v713_v22 = vld [vmem:[%s2397_s26 + $0x58] sm:$0xff]  ;;  %v617_v49 = vadd.s32 16, %v2538_v45  ;;  %v632_v50 = vadd.s32 %v2542_v47, %v2538_v45  ;;  %v620_v53 = vadd.s32 40, %v2538_v45  ;;  %v616_v54 = vadd.s32 8, %v2538_v45 }
  0x6f   : > { %2051 = vset.pattern.permute.xlu2 %v2282_v5  ;;  %v540_v16 = vsel %vm499_vm1, %v1943_v13, 0  ;;  %v711_v19 = vld [vmem:[%s2397_s26 + $0x48] sm:$0xff]  ;;  %v537_v21 = vsel %vm499_vm1, %v1942_v18, 0  ;;  %v1941_v23 = vld [vmem:[%s2417_s20 + $0x18] sm:$0xff]  ;;  %v714_v24 = vld [vmem:[%s2397_s26 + $0x60] sm:$0xff]  ;;  %v618_v56 = vadd.s32 24, %v2538_v45 }
  0x70   : > { %732 = vperm.xlu2 %2051, %v706_v8   ;;  %v715_v25 = vld [vmem:[%s2397_s26 + $0x68] sm:$0xff]  ;;  %v534_v26 = vsel %vm499_vm1, %v1941_v23, 0  ;;  %v716_v27 = vld [vmem:[%s2397_s26 + $0x70] sm:$0xff]  ;;  %v717_v29 = vld [vmem:[%s2397_s26 + $0x78] sm:$0xff]  ;;  %v634_v52 = vadd.s32 %v2542_v47, %v617_v49  ;;  %v637_v58 = vadd.s32 %v2542_v47, %v620_v53  ;;  %v619_v59 = vadd.s32 32, %v2538_v45 }
  0x71   : > { %v1940_v28 = vld [vmem:[%s2417_s20 + $0x10] sm:$0xff]  ;;  %v1939_v31 = vld [vmem:[%s2417_s20 + $0x8] sm:$0xff]  ;;  %v1938_v33 = vld [vmem:[%s2417_s20] sm:$0xff]  ;;  %s1923_s20 = sshll.u32 %s2262_s21, 7  ;;  %v633_v61 = vadd.s32 %v2542_v47, %v616_v54  ;;  %v635_v0 = vadd.s32 %v2542_v47, %v618_v56  ;;  %v623_v2 = vadd.s32 64, %v2538_v45  ;;  %v621_v6 = vadd.s32 48, %v2538_v45 }
  0x72   : > { %v531_v30 = vsel %vm499_vm1, %v1940_v28, 0  ;;  %v528_v32 = vsel %vm499_vm1, %v1939_v31, 0  ;;  %v525_v34 = vsel %vm499_vm1, %v1938_v33, 0  ;;  %v1930_v35 = vld [vmem:[%s2411_s9] sm:$0xff]  ;;  %v1932_v36 = vld [vmem:[%s2411_s9 + $0x10] sm:$0xff]  ;;  %v1931_v39 = vld [vmem:[%s2411_s9 + $0x8] sm:$0xff]  ;;  %v651_v48 = vstv %s1923_s20 }
  0x73   : > { %v1934_v37 = vld [vmem:[%s2411_s9 + $0x20] sm:$0xff]  ;;  %v1936_v38 = vld [vmem:[%s2411_s9 + $0x30] sm:$0xff]  ;;  %v1933_v40 = vld [vmem:[%s2411_s9 + $0x18] sm:$0xff]  ;;  %v2547_v51 = vadd.s32 %v651_v48, %v650_v46  ;;  %v636_v3 = vadd.s32 %v2542_v47, %v619_v59  ;;  %v626_v18 = vadd.s32 88, %v2538_v45  ;;  %v625_v31 = vadd.s32 80, %v2538_v45 }
  0x74   : > { %729 = vperm.xlu1 %2050, %v705_v9   ;;  %723 = vperm.xlu0 %2049, %v703_v10   ;;  %v1935_v41 = vld [vmem:[%s2411_s9 + $0x28] sm:$0xff]  ;;  %v1937_v42 = vld [vmem:[%s2411_s9 + $0x38] sm:$0xff]  ;;  %v2560_v57 = vld [vmem:[%s298_s8] ss:$0 sm:$0xff]  ;;  %v640_v10 = vadd.s32 %v2542_v47, %v623_v2  ;;  %v629_v33 = vadd.s32 112, %v2538_v45  ;;  %v3420_v53 = vmov 0 }
  0x75   : > { %549 = vmatpush.bf16.xpose.msra.mxu0 %v543_v11  ;;  %1950 = vmatpush.bf16.xpose.msra.mxu1 %v543_v11  ;;  %vm653_vm2 = vcmp.ne.s32.totalorder %v632_v50, %v2547_v51  ;;  %vm3375_vm3 = vcmp.lt.s32.totalorder %v2547_v51, 144  ;;  %vm655_vm4 = vcmp.ne.s32.totalorder %v634_v52, %v2547_v51  ;;  %vm658_vm9 = vcmp.ne.s32.totalorder %v637_v58, %v2547_v51 }
  0x76   : > { %1951 = vmatpush.bf16.xpose.msra.mxu2 %v543_v11  ;;  %1952 = vmatpush.bf16.xpose.msra.mxu3 %v543_v11  ;;  %vm2567_vm5 = vmand %vm653_vm2, %vm3375_vm3  ;;  %vm654_vm11 = vcmp.ne.s32.totalorder %v633_v61, %v2547_v51  ;;  %vm656_vm15 = vcmp.ne.s32.totalorder %v635_v0, %v2547_v51  ;;  %v628_v50 = vadd.s32 104, %v2538_v45  ;;  %v630_v54 = vadd.s32 120, %v2538_v45 }
  0x77   : > { %vm2575_vm6 = vmand %vm655_vm4, %vm3375_vm3 }
  0x78   : > { %735 = vperm.xlu2 %2051, %v707_v12   ;;  %v3397_v1 = vsel %vm2575_vm6, 4294967295, %v3396_v1  ;;  %vm2600_vm14 = vmand %vm658_vm9, %vm3375_vm3  ;;  %v638_v12 = vadd.s32 %v2542_v47, %v621_v6  ;;  %v647_v59 = vadd.s32 %v2542_v47, %v630_v54 }
  0x79   : > { %vm2609_vm0 = vmand %vm654_vm11, %vm3375_vm3 }
  0x7a   : > { %vm2619_vm4 = vmand %vm656_vm15, %vm3375_vm3  ;;  %vm659_vm15 = vcmp.ne.s32.totalorder %v638_v12, %v2547_v51 }
  0x7c   : > { %738 = vperm.xlu0 %2049, %v708_v14   ;;  %741 = vperm.xlu1 %2050, %v709_v15   ;;  %v3402_v15 = vmov 0 }
  0x7d   : > { %550 = vmatpush.bf16.xpose.msra.mxu0 %v540_v16  ;;  %1953 = vmatpush.bf16.xpose.msra.mxu1 %v540_v16  ;;  %v3403_v15 = vsel %vm2619_vm4, 4294967295, %v3402_v15 }
  0x7e   : > { %1954 = vmatpush.bf16.xpose.msra.mxu2 %v540_v16  ;;  %1955 = vmatpush.bf16.xpose.msra.mxu3 %v540_v16  ;;  %v622_v16 = vadd.s32 56, %v2538_v45 }
  0x80   : > { %744 = vperm.xlu2 %2051, %v710_v17   ;;  %v639_v23 = vadd.s32 %v2542_v47, %v622_v16 }
  0x84   : > { %747 = vperm.xlu0 %2049, %v711_v19   ;;  %750 = vperm.xlu1 %2050, %v712_v20   ;;  %v624_v20 = vadd.s32 72, %v2538_v45 }
  0x85   : > { %551 = vmatpush.bf16.xpose.msra.mxu0 %v537_v21  ;;  %1956 = vmatpush.bf16.xpose.msra.mxu1 %v537_v21 }
  0x86   : > { %1957 = vmatpush.bf16.xpose.msra.mxu2 %v537_v21  ;;  %1958 = vmatpush.bf16.xpose.msra.mxu3 %v537_v21 }
  0x88   : > { %753 = vperm.xlu2 %2051, %v713_v22  }
  0x8c   : > { %756 = vperm.xlu0 %2049, %v714_v24   ;;  %759 = vperm.xlu1 %2050, %v715_v25   ;;  %v643_v25 = vadd.s32 %v2542_v47, %v626_v18 }
  0x8d   : > { %552 = vmatpush.bf16.xpose.msra.mxu0 %v534_v26  ;;  %1959 = vmatpush.bf16.xpose.msra.mxu1 %v534_v26 }
  0x8e   : > { %1960 = vmatpush.bf16.xpose.msra.mxu2 %v534_v26  ;;  %1961 = vmatpush.bf16.xpose.msra.mxu3 %v534_v26  ;;  %v3408_v26 = vmov 0 }
  0x90   : > { %762 = vperm.xlu2 %2051, %v716_v27   ;;  %v641_v27 = vadd.s32 %v2542_v47, %v624_v20 }
  0x94   : > { %765 = vperm.xlu0 %2049, %v717_v29  }
  0x95   : > { %553 = vmatpush.bf16.xpose.msra.mxu0 %v531_v30  ;;  %1962 = vmatpush.bf16.xpose.msra.mxu1 %v531_v30 }
  0x96   : > { %1963 = vmatpush.bf16.xpose.msra.mxu2 %v531_v30  ;;  %1964 = vmatpush.bf16.xpose.msra.mxu3 %v531_v30 }
  0x9d   : > { %554 = vmatpush.bf16.xpose.msra.mxu0 %v528_v32  ;;  %1965 = vmatpush.bf16.xpose.msra.mxu1 %v528_v32 }
  0x9e   : > { %1966 = vmatpush.bf16.xpose.msra.mxu2 %v528_v32  ;;  %1967 = vmatpush.bf16.xpose.msra.mxu3 %v528_v32 }
  0xa5   : > { %555 = vmatpush.bf16.xpose.msra.mxu0 %v525_v34  ;;  %1968 = vmatpush.bf16.xpose.msra.mxu1 %v525_v34 }
  0xa6   : > { %1969 = vmatpush.bf16.xpose.msra.mxu2 %v525_v34  ;;  %1970 = vmatpush.bf16.xpose.msra.mxu3 %v525_v34 }
  0xac   : > { %1914 = vmatmul.msk.bf16.vlgmr.msra.gmra.mxu0 %vm499_vm1, %v1930_v35  ;;  %1916 = vmatmul.msk.bf16.vlgmr.msra.gmra.mxu1 %vm499_vm1, %v1932_v36  ;;  %v627_v35 = vadd.s32 96, %v2538_v45  ;;  %v645_v45 = vadd.s32 %v2542_v47, %v628_v50 }
  0xad   : > { %1918 = vmatmul.msk.bf16.vlgmr.msra.gmra.mxu2 %vm499_vm1, %v1934_v37  ;;  %1920 = vmatmul.msk.bf16.vlgmr.msra.gmra.mxu3 %vm499_vm1, %v1936_v38  ;;  %v3411_v37 = vmov 0  ;;  %v642_v38 = vadd.s32 %v2542_v47, %v625_v31 }
  0xbc   : > { %1915 = vmatmul.msk.bf16.gmra.mxu0 %vm499_vm1, %v1931_v39  ;;  %1917 = vmatmul.msk.bf16.gmra.mxu1 %vm499_vm1, %v1933_v40  ;;  %v3414_v39 = vmov 0 }
  0xbd   : > { %1919 = vmatmul.msk.bf16.gmra.mxu2 %vm499_vm1, %v1935_v41  ;;  %1921 = vmatmul.msk.bf16.gmra.mxu3 %vm499_vm1, %v1937_v42  ;;  %vm657_vm1 = vcmp.ne.s32.totalorder %v636_v3, %v2547_v51  ;;  %v646_v41 = vadd.s32 %v2542_v47, %v629_v33  ;;  %v644_v42 = vadd.s32 %v2542_v47, %v627_v35 }
  0xbe   : > { %vm2628_vm9 = vmand %vm657_vm1, %vm3375_vm3 }
  0xca   : > { %v2534_v44 = vpop.permute.xlu2 %732 }
  0xcb   : > { %vm772_vm11 = vcmp.eq.s32.totalorder %v2534_v44, %v2560_v57 }
  0xd2   : > { %v736_v55 = vpop.permute.xlu2 %735 }
  0xd3   : > { %vm773_vm13 = vcmp.eq.s32.totalorder %v736_v55, %v2560_v57  ;;  %v3423_v55 = vmov 0 }
  0xd4   : > { %vm789_vm2 = vmand %vm773_vm13, %vm2600_vm14 }
  0xd5   : > { %v2639_v19 = vsel %vm789_vm2, 1.0, %v2283_v4 }
  0xda   : > { %v745_v9 = vpop.permute.xlu2 %744 }
  0xdb   : > { %vm776_vm1 = vcmp.eq.s32.totalorder %v745_v9, %v2560_v57 }
  0xde   : > { %v727_v62 = vpop.permute.xlu1 %726  ;;  %v721_v63 = vpop.permute.xlu0 %720 }
  0xdf   : > { %vm770_vm7 = vcmp.eq.s32.totalorder %v727_v62, %v2560_v57  ;;  %vm768_vm8 = vcmp.eq.s32.totalorder %v721_v63, %v2560_v57 }
  0xe0   : > { %vm784_vm10 = vmand %vm768_vm8, %vm2567_vm5 }
  0xe1   : > { %v2587_v5 = vsel %vm784_vm10, 1.0, %v2283_v4  ;;  %vm786_vm12 = vmand %vm770_vm7, %vm2575_vm6  ;;  %vm661_vm10 = vcmp.ne.s32.totalorder %v640_v10, %v2547_v51 }
  0xe2   : > { %1185 = vadd.xlane.f32.xlu2 %v2587_v5  ;;  %v2595_v7 = vsel %vm786_vm12, 1.0, %v2283_v4  ;;  %vm2656_vm2 = vmand %vm661_vm10, %vm3375_vm3  ;;  %v754_v28 = vpop.permute.xlu2 %753 }
  0xe3   : > { %1189 = vadd.xlane.f32.xlu0 %v2595_v7  ;;  %vm792_vm10 = vmand %vm776_vm1, %vm2656_vm2  ;;  %vm662_vm1 = vcmp.ne.s32.totalorder %v641_v27, %v2547_v51 }
  0xe4   : > { %v2686_v34 = vsel %vm792_vm10, 1.0, %v2283_v4 }
  0xe6   : > { %v730_v13 = vpop.permute.xlu1 %729  ;;  %v724_v14 = vpop.permute.xlu0 %723 }
  0xe7   : > { %vm771_vm7 = vcmp.eq.s32.totalorder %v730_v13, %v2560_v57  ;;  %vm769_vm8 = vcmp.eq.s32.totalorder %v724_v14, %v2560_v57 }
  0xe8   : > { %vm785_vm12 = vmand %vm769_vm8, %vm2609_vm0 }
  0xe9   : > { %v2643_v21 = vsel %vm785_vm12, 1.0, %v2283_v4  ;;  %vm787_vm13 = vmand %vm771_vm7, %vm2619_vm4 }
  0xea   : > { %1187 = vadd.xlane.f32.xlu1 %v2643_v21  ;;  %v2650_v22 = vsel %vm787_vm13, 1.0, %v2283_v4  ;;  %vm788_vm7 = vmand %vm772_vm11, %vm2628_vm9  ;;  %vm660_vm11 = vcmp.ne.s32.totalorder %v639_v23, %v2547_v51  ;;  %vm664_vm13 = vcmp.ne.s32.totalorder %v643_v25, %v2547_v51  ;;  %v763_v48 = vpop.permute.xlu2 %762 }
  0xeb   : > { %1191 = vadd.xlane.f32.xlu2 %v2650_v22  ;;  %1195 = vadd.xlane.f32.xlu0 %v2639_v19  ;;  %vm2667_vm8 = vmand %vm659_vm15, %vm3375_vm3  ;;  %v2678_v32 = vsel %vm788_vm7, 1.0, %v2283_v4  ;;  %vm3410_vm7 = vcmp.lt.s32.totalorder %v2547_v51, 144 }
  0xec   : > { %v3409_v26 = vsel %vm2667_vm8, 4294967295, %v3408_v26  ;;  %vm2695_vm4 = vmand %vm660_vm11, %vm3410_vm7 }
  0xed   : > { %v3412_v37 = vsel %vm2695_vm4, 4294967295, %v3411_v37  ;;  %vm3413_vm10 = vmmov %vm3410_vm7 }
  0xee   : > { %v739_v29 = vpop.permute.xlu0 %738  ;;  %v742_v30 = vpop.permute.xlu1 %741 }
  0xef   : > { %vm774_vm12 = vcmp.eq.s32.totalorder %v739_v29, %v2560_v57  ;;  %vm775_vm3 = vcmp.eq.s32.totalorder %v742_v30, %v2560_v57 }
  0xf0   : > { %vm790_vm15 = vmand %vm774_vm12, %vm2667_vm8  ;;  %vm779_vm12 = vcmp.eq.s32.totalorder %v754_v28, %v2560_v57 }
  0xf1   : > { %v2691_v36 = vsel %vm790_vm15, 1.0, %v2283_v4  ;;  %vm2704_vm8 = vmand %vm664_vm13, %vm3413_vm10  ;;  %vm663_vm10 = vcmp.ne.s32.totalorder %v642_v38, %v2547_v51 }
  0xf2   : > { %1193 = vadd.xlane.f32.xlu1 %v2678_v32  ;;  %v3415_v39 = vsel %vm2704_vm8, 4294967295, %v3414_v39  ;;  %vm3416_vm15 = vmmov %vm3410_vm7 }
  0xf3   : > { %1197 = vadd.xlane.f32.xlu2 %v2691_v36  ;;  %vm2711_vm11 = vmand %vm662_vm1, %vm3416_vm15  ;;  %1201 = vadd.xlane.f32.xlu0 %v2686_v34  ;;  %vm667_vm15 = vcmp.ne.s32.totalorder %v646_v41, %v2547_v51 }
  0xf4   : > { %vm791_vm7 = vmand %vm775_vm3, %vm2695_vm4  ;;  %vm665_vm4 = vcmp.ne.s32.totalorder %v644_v42, %v2547_v51 }
  0xf5   : > { %vm795_vm13 = vmand %vm779_vm12, %vm2704_vm8  ;;  %v2725_v46 = vsel %vm791_vm7, 1.0, %v2283_v4  ;;  %vm3419_vm7 = vcmp.lt.s32.totalorder %v2547_v51, 144 }
  0xf6   : > { %v748_v43 = vpop.permute.xlu0 %747  ;;  %v751_v44 = vpop.permute.xlu1 %750  ;;  %v2732_v49 = vsel %vm795_vm13, 1.0, %v2283_v4  ;;  %vm2741_vm8 = vmand %vm663_vm10, %vm3419_vm7 }
  0xf7   : > { %vm777_vm1 = vcmp.eq.s32.totalorder %v748_v43, %v2560_v57  ;;  %vm778_vm12 = vcmp.eq.s32.totalorder %v751_v44, %v2560_v57  ;;  %v3421_v53 = vsel %vm2741_vm8, 4294967295, %v3420_v53  ;;  %vm3422_vm13 = vmmov %vm3419_vm7 }
  0xf8   : > { %vm793_vm3 = vmand %vm777_vm1, %vm2711_vm11  ;;  %vm782_vm1 = vcmp.eq.s32.totalorder %v763_v48, %v2560_v57 }
  0xf9   : > { %v2737_v52 = vsel %vm793_vm3, 1.0, %v2283_v4  ;;  %vm2750_vm6 = vmand %vm667_vm15, %vm3422_vm13 }
  0xfa   : > { %1199 = vadd.xlane.f32.xlu1 %v2725_v46  ;;  %v3424_v55 = vsel %vm2750_vm6, 4294967295, %v3423_v55  ;;  %vm3425_vm3 = vmmov %vm3419_vm7 }
  0xfb   : > { %1203 = vadd.xlane.f32.xlu2 %v2737_v52  ;;  %vm2757_vm10 = vmand %vm665_vm4, %vm3425_vm3  ;;  %1207 = vadd.xlane.f32.xlu0 %v2732_v49  ;;  %vm666_vm3 = vcmp.ne.s32.totalorder %v645_v45, %v2547_v51  ;;  %v1171_v45 = vld [vmem:[#allocation4 + $0x10] sm:$0xff] }
  0xfc   : > { %vm794_vm7 = vmand %vm778_vm12, %vm2741_vm8  ;;  %vm668_vm12 = vcmp.ne.s32.totalorder %v647_v59, %v2547_v51 }
  0xfd   : > { %vm798_vm15 = vmand %vm782_vm1, %vm2750_vm6  ;;  %v2770_v61 = vsel %vm794_vm7, 1.0, %v2283_v4  ;;  %vm3428_vm7 = vcmp.lt.s32.totalorder %v2547_v51, 144 }
  0xfe   : > { %v757_v58 = vpop.permute.xlu0 %756  ;;  %v760_v62 = vpop.permute.xlu1 %759  ;;  %v2776_v63 = vsel %vm798_vm15, 1.0, %v2283_v4  ;;  %vm2784_vm6 = vmand %vm666_vm3, %vm3428_vm7 }
  0xff   : > { %vm780_vm13 = vcmp.eq.s32.totalorder %v757_v58, %v2560_v57  ;;  %vm781_vm1 = vcmp.eq.s32.totalorder %v760_v62, %v2560_v57  ;;  %vm3431_vm15 = vmmov %vm3428_vm7 }
 0x100   : > { %vm796_vm4 = vmand %vm780_vm13, %vm2757_vm10 }
 0x101   : > { %v812_v0 = vsel %vm796_vm4, 1.0, %v2283_v4  ;;  %vm2791_vm13 = vmand %vm668_vm12, %vm3431_vm15 }
 0x102   : > { %1205 = vadd.xlane.f32.xlu1 %v2770_v61  ;;  %vm797_vm4 = vmand %vm781_vm1, %vm2784_vm6 }
 0x103   : > { %1209 = vadd.xlane.f32.xlu2 %v812_v0  ;;  %1213 = vadd.xlane.f32.xlu0 %v2776_v63  ;;  %v2801_v6 = vsel %vm797_vm4, 1.0, %v2283_v4 }
 0x106   : > { %v766_v3 = vpop.permute.xlu0 %765 }
 0x107   : > { %vm783_vm8 = vcmp.eq.s32.totalorder %v766_v3, %v2560_v57 }
 0x108   : > { %vm799_vm3 = vmand %vm783_vm8, %vm2791_vm13  ;;  %vm3439_vm8 = vnez %v3403_v15 }
 0x109   : > { %v2804_v9 = vsel %vm799_vm3, 1.0, %v2283_v4 }
 0x10a   : > { %1211 = vadd.xlane.f32.xlu1 %v2801_v6 }
 0x10b   : > { %1215 = vadd.xlane.f32.xlu2 %v2804_v9 }
 0x129   : > { %v557_v51 = vpop.f32.mrf.mxu0  ;;  %v567_v10 = vpop.f32.mrf.mxu1 }
 0x12a   : > { %v597_v12 = vmul.f32 14.285714, %v557_v51  ;;  %v601_v13 = vmul.f32 14.285714, %v567_v10  ;;  %v1170_v51 = vld [vmem:[#allocation4 + $0x8] sm:$0xff] }
 0x12c   : > { %v2810_v57 = vsel %vm2628_vm9, %v601_v13, -1e+30  ;;  %v2814_v14 = vsel %vm2567_vm5, %v597_v12, -1e+30  ;;  %vm3434_vm5 = vnez %v3397_v1  ;;  %v1172_v12 = vld [vmem:[#allocation4 + $0x18] sm:$0xff]  ;;  %v1174_v13 = vld [vmem:[#allocation4 + $0x28] sm:$0xff]  ;;  %vm3437_vm9 = vnez %v3412_v37 }
 0x12d   : > { %832 = vmax.xlane.f32.xlu1 %v2814_v14  ;;  %v1269_v4 = vmul.f32 %v2678_v32, %v2810_v57  ;;  %v1265_v24 = vmul.f32 %v2587_v5, %v2814_v14 }
 0x12f   : > { %1289 = vadd.xlane.f32.xlu0 %v1269_v4 }
 0x130   : > { %v577_v16 = vpop.f32.mrf.mxu2  ;;  %v587_v18 = vpop.f32.mrf.mxu3 }
 0x131   : > { %v605_v20 = vmul.f32 14.285714, %v577_v16  ;;  %v609_v23 = vmul.f32 14.285714, %v587_v18  ;;  %v559_v25 = vpop.f32.mrf.mxu0  ;;  %v569_v29 = vpop.f32.mrf.mxu1 }
 0x132   : > { %v598_v60 = vmul.f32 14.285714, %v559_v25  ;;  %v602_v31 = vmul.f32 14.285714, %v569_v29 }
 0x133   : > { %v2821_v17 = vsel %vm2656_vm2, %v605_v20, -1e+30  ;;  %v2827_v27 = vsel %vm2757_vm10, %v609_v23, -1e+30  ;;  %vm3438_vm2 = vnez %v3424_v55 }
 0x134   : > { %848 = vmax.xlane.f32.xlu2 %v2821_v17  ;;  %v2832_v28 = vsel %vm2609_vm0, %v598_v60, -1e+30  ;;  %v2841_v35 = vsel %vm2600_vm14, %v602_v31, -1e+30  ;;  %v1277_v11 = vmul.f32 %v812_v0, %v2827_v27  ;;  %v1273_v8 = vmul.f32 %v2686_v34, %v2821_v17  ;;  %v1169_v34 = vld [vmem:[#allocation4] sm:$0xff] }
 0x135   : > { %840 = vmax.xlane.f32.xlu1 %v2810_v57  ;;  %v1266_v30 = vmul.f32 %v2643_v21, %v2832_v28  ;;  %v1270_v50 = vmul.f32 %v2639_v19, %v2841_v35  ;;  %vm3435_vm14 = vnez %v3409_v26  ;;  %vm3436_vm0 = vnez %v3421_v53  ;;  %v1177_v31 = vld [vmem:[#allocation4 + $0x40] sm:$0xff] }
 0x137   : > { %856 = vmax.xlane.f32.xlu0 %v2827_v27 }
 0x138   : > { %v579_v32 = vpop.f32.mrf.mxu2  ;;  %v589_v5 = vpop.f32.mrf.mxu3 }
 0x139   : > { %v606_v33 = vmul.f32 14.285714, %v579_v32  ;;  %v562_v41 = vpop.f32.mrf.mxu0  ;;  %v610_v21 = vmul.f32 14.285714, %v589_v5  ;;  %v572_v44 = vpop.f32.mrf.mxu1 }
 0x13a   : > { %v599_v42 = vmul.f32 14.285714, %v562_v41  ;;  %v603_v48 = vmul.f32 14.285714, %v572_v44 }
 0x13b   : > { %v2847_v38 = vsel %vm2711_vm11, %v606_v33, -1e+30  ;;  %v2854_v43 = vsel %vm2784_vm6, %v610_v21, -1e+30  ;;  %vm1136_vm6 = vcmask 7168   ;;  %vm3440_vm11 = vnez %v3415_v39 }
 0x13c   : > { %834 = vmax.xlane.f32.xlu2 %v2832_v28  ;;  %v2859_v40 = vsel %vm3434_vm5, %v599_v42, -1e+30  ;;  %v1274_v56 = vmul.f32 %v2737_v52, %v2847_v38  ;;  %v2868_v62 = vsel %vm3435_vm14, %v603_v48, -1e+30 }
 0x13d   : > { %1281 = vadd.xlane.f32.xlu1 %v1265_v24  ;;  %v1267_v47 = vmul.f32 %v2595_v7, %v2859_v40  ;;  %v1271_v26 = vmul.f32 %v2691_v36, %v2868_v62  ;;  %v1173_v24 = vld [vmem:[#allocation4 + $0x20] sm:$0xff] }
 0x13f   : > { %1283 = vadd.xlane.f32.xlu0 %v1266_v30  ;;  %v1175_v30 = vld [vmem:[#allocation4 + $0x30] sm:$0xff] }
 0x140   : > { %v582_v54 = vpop.f32.mrf.mxu2  ;;  %v592_v10 = vpop.f32.mrf.mxu3 }
 0x141   : > { %v607_v1 = vmul.f32 14.285714, %v582_v54  ;;  %v574_v3 = vpop.f32.mrf.mxu1  ;;  %v611_v25 = vmul.f32 14.285714, %v592_v10  ;;  %v564_v29 = vpop.f32.mrf.mxu0  ;;  %v1180_v54 = vld [vmem:[#allocation4 + $0x58] sm:$0xff] }
 0x142   : > { %v604_v53 = vmul.f32 14.285714, %v574_v3  ;;  %v600_v41 = vmul.f32 14.285714, %v564_v29  ;;  %v1181_v3 = vld [vmem:[#allocation4 + $0x60] sm:$0xff] }
 0x143   : > { %v2875_v52 = vsel %vm3436_vm0, %v607_v1, -1e+30 }
 0x144   : > { %842 = vmax.xlane.f32.xlu2 %v2841_v35  ;;  %v1275_v16 = vmul.f32 %v2770_v61, %v2875_v52  ;;  %v2887_v36 = vsel %vm3437_vm9, %v604_v53, -1e+30  ;;  %v2892_v61 = vsel %vm3438_vm2, %v611_v25, -1e+30  ;;  %v2903_v44 = vsel %vm3439_vm8, %v600_v41, -1e+30 }
 0x145   : > { %1305 = vadd.xlane.f32.xlu1 %v1277_v11  ;;  %v1272_v37 = vmul.f32 %v2725_v46, %v2887_v36  ;;  %v1176_v46 = vld [vmem:[#allocation4 + $0x38] sm:$0xff]  ;;  %v1268_v2 = vmul.f32 %v2650_v22, %v2903_v44  ;;  %v1182_v22 = vld [vmem:[#allocation4 + $0x68] sm:$0xff]  ;;  %v2947_v41 = vld [vmem:[#allocation2 + $0x60] sm:$0xff] }
 0x146   : > { %v1184_v53 = vld [vmem:[#allocation4 + $0x78] sm:$0xff] }
 0x147   : > { %850 = vmax.xlane.f32.xlu0 %v2847_v38 }
 0x148   : > { %v594_v21 = vpop.f32.mrf.mxu3  ;;  %v584_v48 = vpop.f32.mrf.mxu2 }
 0x14c   : > { %1297 = vadd.xlane.f32.xlu2 %v1273_v8  ;;  %v612_v8 = vmul.f32 14.285714, %v594_v21 }
 0x14d   : > { %858 = vmax.xlane.f32.xlu1 %v2854_v43 }
 0x14f   : > { %836 = vmax.xlane.f32.xlu0 %v2859_v40 }
 0x154   : > { %1291 = vadd.xlane.f32.xlu2 %v1270_v50  ;;  %v1178_v50 = vld [vmem:[#allocation4 + $0x48] sm:$0xff] }
 0x155   : > { %v1186_v58 = vpop.xlane.xlu2 %1185  ;;  %1299 = vadd.xlane.f32.xlu1 %v1274_v56 }
 0x156   : > { %v1217_v59 = vadd.f32 %v1186_v58, %v1169_v34  ;;  %v1190_v0 = vpop.xlane.xlu0 %1189  ;;  %v2909_v58 = vsel %vm2791_vm13, %v612_v8, -1e+30 }
 0x157   : > { %844 = vmax.xlane.f32.xlu0 %v2868_v62  ;;  %v1219_v19 = vadd.f32 %v1190_v0, %v1171_v45 }
 0x158   : > { %1233 = vst.msk [vmem:[#allocation4] sm:$0xff] %vm1136_vm6, %v1217_v59  ;;  %v608_v59 = vmul.f32 14.285714, %v584_v48 }
 0x159   : > { %1235 = vst.msk [vmem:[#allocation4 + $0x10] sm:$0xff] %vm1136_vm6, %v1219_v19 }
 0x15a   : > { %v2917_v19 = vsel %vm3440_vm11, %v608_v59, -1e+30 }
 0x15b   : > { %v1276_v39 = vmul.f32 %v2732_v49, %v2917_v19 }
 0x15c   : > { %1285 = vadd.xlane.f32.xlu2 %v1267_v47  ;;  %v1179_v47 = vld [vmem:[#allocation4 + $0x50] sm:$0xff] }
 0x15d   : > { %v1188_v4 = vpop.xlane.xlu1 %1187  ;;  %1293 = vadd.xlane.f32.xlu1 %v1271_v26 }
 0x15e   : > { %v1218_v18 = vadd.f32 %v1188_v4, %v1170_v51  ;;  %v1192_v20 = vpop.xlane.xlu2 %1191  ;;  %v1196_v23 = vpop.xlane.xlu0 %1195  ;;  %v1183_v51 = vld [vmem:[#allocation4 + $0x70] sm:$0xff] }
 0x15f   : > { %v1220_v7 = vadd.f32 %v1192_v20, %v1172_v12  ;;  %1301 = vadd.xlane.f32.xlu0 %v1275_v16  ;;  %v1222_v60 = vadd.f32 %v1196_v23, %v1174_v13 }
 0x160   : > { %1234 = vst.msk [vmem:[#allocation4 + $0x8] sm:$0xff] %vm1136_vm6, %v1218_v18 }
 0x161   : > { %1236 = vst.msk [vmem:[#allocation4 + $0x18] sm:$0xff] %vm1136_vm6, %v1220_v7  ;;  %v2929_v7 = vld [vmem:[#allocation2] sm:$0xff] }
 0x162   : > { %1238 = vst.msk [vmem:[#allocation4 + $0x28] sm:$0xff] %vm1136_vm6, %v1222_v60 }
 0x164   : > { %860 = vmax.xlane.f32.xlu2 %v2892_v61 }
 0x165   : > { %v1194_v32 = vpop.xlane.xlu1 %1193  ;;  %852 = vmax.xlane.f32.xlu1 %v2875_v52 }
 0x166   : > { %v1221_v33 = vadd.f32 %v1194_v32, %v1173_v24  ;;  %v1198_v11 = vpop.xlane.xlu2 %1197  ;;  %v1202_v5 = vpop.xlane.xlu0 %1201  ;;  %v1253_v24 = vld [vmem:[#allocation5 + $0x20] sm:$0xff] }
 0x167   : > { %v1223_v55 = vadd.f32 %v1198_v11, %v1175_v30  ;;  %1295 = vadd.xlane.f32.xlu0 %v1272_v37  ;;  %v1225_v42 = vadd.f32 %v1202_v5, %v1177_v31  ;;  %v2940_v32 = vld [vmem:[#allocation2 + $0x40] sm:$0xff] }
 0x168   : > { %1237 = vst.msk [vmem:[#allocation4 + $0x20] sm:$0xff] %vm1136_vm6, %v1221_v33  ;;  %v2942_v37 = vld [vmem:[#allocation2 + $0x20] sm:$0xff] }
 0x169   : > { %1239 = vst.msk [vmem:[#allocation4 + $0x30] sm:$0xff] %vm1136_vm6, %v1223_v55 }
 0x16a   : > { %1241 = vst.msk [vmem:[#allocation4 + $0x40] sm:$0xff] %vm1136_vm6, %v1225_v42 }
 0x16c   : > { %838 = vmax.xlane.f32.xlu2 %v2903_v44 }
 0x16d   : > { %v1200_v34 = vpop.xlane.xlu1 %1199  ;;  %846 = vmax.xlane.f32.xlu1 %v2887_v36 }
 0x16e   : > { %v1224_v56 = vadd.f32 %v1200_v34, %v1176_v46  ;;  %v1204_v45 = vpop.xlane.xlu2 %1203  ;;  %v1208_v1 = vpop.xlane.xlu0 %1207 }
 0x16f   : > { %v1226_v15 = vadd.f32 %v1204_v45, %v1178_v50  ;;  %862 = vmax.xlane.f32.xlu0 %v2909_v58  ;;  %v1228_v0 = vadd.f32 %v1208_v1, %v1180_v54  ;;  %v2970_v50 = vld [vmem:[#allocation2 + $0x8] sm:$0xff]  ;;  %v1249_v54 = vld [vmem:[#allocation5] sm:$0xff] }
 0x170   : > { %1240 = vst.msk [vmem:[#allocation4 + $0x38] sm:$0xff] %vm1136_vm6, %v1224_v56  ;;  %v1250_v1 = vld [vmem:[#allocation5 + $0x8] sm:$0xff] }
 0x171   : > { %1242 = vst.msk [vmem:[#allocation4 + $0x48] sm:$0xff] %vm1136_vm6, %v1226_v15 }
 0x172   : > { %1244 = vst.msk [vmem:[#allocation4 + $0x58] sm:$0xff] %vm1136_vm6, %v1228_v0 }
 0x174   : > { %854 = vmax.xlane.f32.xlu2 %v2917_v19 }
 0x175   : > { %v1206_v26 = vpop.xlane.xlu1 %1205  ;;  %1287 = vadd.xlane.f32.xlu1 %v1268_v2  ;;  %v2982_v2 = vld [vmem:[#allocation2 + $0x28] sm:$0xff] }
 0x176   : > { %v1227_v10 = vadd.f32 %v1206_v26, %v1179_v47  ;;  %v1210_v12 = vpop.xlane.xlu2 %1209  ;;  %v1214_v13 = vpop.xlane.xlu0 %1213 }
 0x177   : > { %v1229_v4 = vadd.f32 %v1210_v12, %v1181_v3  ;;  %v1231_v16 = vadd.f32 %v1214_v13, %v1183_v51  ;;  %v1261_v3 = vld [vmem:[#allocation5 + $0x60] sm:$0xff]  ;;  %v2987_v12 = vld [vmem:[#allocation2 + $0x48] sm:$0xff] }
 0x178   : > { %1243 = vst.msk [vmem:[#allocation4 + $0x50] sm:$0xff] %vm1136_vm6, %v1227_v10 }
 0x179   : > { %1245 = vst.msk [vmem:[#allocation4 + $0x60] sm:$0xff] %vm1136_vm6, %v1229_v4 }
 0x17a   : > { %1247 = vst.msk [vmem:[#allocation4 + $0x70] sm:$0xff] %vm1136_vm6, %v1231_v16 }
 0x17c   : > { %1303 = vadd.xlane.f32.xlu2 %v1276_v39 }
 0x17d   : > { %v1212_v18 = vpop.xlane.xlu1 %1211 }
 0x17e   : > { %v1230_v20 = vadd.f32 %v1212_v18, %v1182_v22  ;;  %v1216_v23 = vpop.xlane.xlu2 %1215  ;;  %v3003_v18 = vld [vmem:[#allocation2 + $0x68] sm:$0xff] }
 0x17f   : > { %v1232_v25 = vadd.f32 %v1216_v23, %v1184_v53  ;;  %v1257_v53 = vld [vmem:[#allocation5 + $0x40] sm:$0xff] }
 0x180   : > { %1246 = vst.msk [vmem:[#allocation4 + $0x68] sm:$0xff] %vm1136_vm6, %v1230_v20 }
 0x181   : > { %1248 = vst.msk [vmem:[#allocation4 + $0x78] sm:$0xff] %vm1136_vm6, %v1232_v25 }
 0x1a0   : > { %v833_v60 = vpop.xlane.xlu1 %832 }
 0x1a1   : > { %v2932_v29 = vmax.f32 %v2929_v7, %v833_v60  ;;  %v3005_v60 = vld [vmem:[#allocation2 + $0x10] sm:$0xff] }
 0x1a2   : > { %v1290_v49 = vpop.xlane.xlu0 %1289 }
 0x1a3   : > { %1153 = vst.msk [vmem:[#allocation2] sm:$0xff] %vm1136_vm6, %v2932_v29  ;;  %v1317_v31 = vadd.f32 %v1290_v49, %v1253_v24  ;;  %962 = vperm.xlu1 %2050, %v2932_v29  }
 0x1a5   : > { %1333 = vst.msk [vmem:[#allocation5 + $0x20] sm:$0xff] %vm1136_vm6, %v1317_v31 }
 0x1a7   : > { %v849_v33 = vpop.xlane.xlu2 %848 }
 0x1a8   : > { %v2945_v11 = vmax.f32 %v2940_v32, %v849_v33  ;;  %v841_v5 = vpop.xlane.xlu1 %840 }
 0x1a9   : > { %v2950_v21 = vmax.f32 %v2942_v37, %v841_v5 }
 0x1aa   : > { %1161 = vst.msk [vmem:[#allocation2 + $0x40] sm:$0xff] %vm1136_vm6, %v2945_v11  ;;  %1002 = vperm.xlu2 %2051, %v2945_v11   ;;  %v857_v42 = vpop.xlane.xlu0 %856 }
 0x1ab   : > { %1157 = vst.msk [vmem:[#allocation2 + $0x20] sm:$0xff] %vm1136_vm6, %v2950_v21  ;;  %v2962_v46 = vmax.f32 %v2947_v41, %v857_v42  ;;  %982 = vperm.xlu0 %2049, %v2950_v21   ;;  %v1254_v42 = vld [vmem:[#allocation5 + $0x28] sm:$0xff] }
 0x1ad   : > { %1165 = vst.msk [vmem:[#allocation2 + $0x60] sm:$0xff] %vm1136_vm6, %v2962_v46  ;;  %1022 = vperm.xlu1 %2050, %v2962_v46  }
 0x1af   : > { %v835_v34 = vpop.xlane.xlu2 %834 }
 0x1b0   : > { %v2973_v56 = vmax.f32 %v2970_v50, %v835_v34  ;;  %v1282_v45 = vpop.xlane.xlu1 %1281 }
 0x1b1   : > { %v1313_v59 = vadd.f32 %v1282_v45, %v1249_v54  ;;  %v1258_v54 = vld [vmem:[#allocation5 + $0x48] sm:$0xff] }
 0x1b2   : > { %1154 = vst.msk [vmem:[#allocation2 + $0x8] sm:$0xff] %vm1136_vm6, %v2973_v56  ;;  %967 = vperm.xlu2 %2051, %v2973_v56   ;;  %v1284_v0 = vpop.xlane.xlu0 %1283 }
 0x1b3   : > { %1329 = vst.msk [vmem:[#allocation5] sm:$0xff] %vm1136_vm6, %v1313_v59  ;;  %v1314_v47 = vadd.f32 %v1284_v0, %v1250_v1  ;;  %v3023_v59 = vld [vmem:[#allocation2 + $0x30] sm:$0xff] }
 0x1b5   : > { %1330 = vst.msk [vmem:[#allocation5 + $0x8] sm:$0xff] %vm1136_vm6, %v1314_v47 }
 0x1b7   : > { %v843_v51 = vpop.xlane.xlu2 %842 }
 0x1b8   : > { %v2985_v26 = vmax.f32 %v2982_v2, %v843_v51  ;;  %v1306_v10 = vpop.xlane.xlu1 %1305 }
 0x1b9   : > { %v1325_v13 = vadd.f32 %v1306_v10, %v1261_v3  ;;  %v1251_v10 = vld [vmem:[#allocation5 + $0x10] sm:$0xff] }
 0x1ba   : > { %1158 = vst.msk [vmem:[#allocation2 + $0x28] sm:$0xff] %vm1136_vm6, %v2985_v26  ;;  %987 = vperm.xlu2 %2051, %v2985_v26   ;;  %v851_v16 = vpop.xlane.xlu0 %850 }
 0x1bb   : > { %1341 = vst.msk [vmem:[#allocation5 + $0x60] sm:$0xff] %vm1136_vm6, %v1325_v13  ;;  %v2996_v39 = vmax.f32 %v2987_v12, %v851_v16  ;;  %v1255_v13 = vld [vmem:[#allocation5 + $0x30] sm:$0xff] }
 0x1bd   : > { %1162 = vst.msk [vmem:[#allocation2 + $0x48] sm:$0xff] %vm1136_vm6, %v2996_v39  ;;  %1007 = vperm.xlu1 %2050, %v2996_v39  }
 0x1bf   : > { %v1298_v20 = vpop.xlane.xlu2 %1297 }
 0x1c0   : > { %v1321_v23 = vadd.f32 %v1298_v20, %v1257_v53  ;;  %v859_v25 = vpop.xlane.xlu1 %858 }
 0x1c1   : > { %v3008_v24 = vmax.f32 %v3003_v18, %v859_v25 }
 0x1c2   : > { %1337 = vst.msk [vmem:[#allocation5 + $0x40] sm:$0xff] %vm1136_vm6, %v1321_v23  ;;  %v837_v49 = vpop.xlane.xlu0 %836  ;;  %v1259_v23 = vld [vmem:[#allocation5 + $0x50] sm:$0xff] }
 0x1c3   : > { %1166 = vst.msk [vmem:[#allocation2 + $0x68] sm:$0xff] %vm1136_vm6, %v3008_v24  ;;  %v3016_v33 = vmax.f32 %v3005_v60, %v837_v49  ;;  %1027 = vperm.xlu0 %2049, %v3008_v24  }
 0x1c5   : > { %1155 = vst.msk [vmem:[#allocation2 + $0x10] sm:$0xff] %vm1136_vm6, %v3016_v33 }
 0x1c7   : > { %v1292_v34 = vpop.xlane.xlu2 %1291 }
 0x1c8   : > { %v1318_v45 = vadd.f32 %v1292_v34, %v1254_v42  ;;  %v1300_v1 = vpop.xlane.xlu1 %1299  ;;  %v3041_v34 = vld [vmem:[#allocation2 + $0x50] sm:$0xff] }
 0x1c9   : > { %v1322_v0 = vadd.f32 %v1300_v1, %v1258_v54  ;;  %v3039_v54 = vld [vmem:[#allocation2 + $0x70] sm:$0xff] }
 0x1ca   : > { %1334 = vst.msk [vmem:[#allocation5 + $0x28] sm:$0xff] %vm1136_vm6, %v1318_v45  ;;  %v845_v47 = vpop.xlane.xlu0 %844 }
 0x1cb   : > { %1338 = vst.msk [vmem:[#allocation5 + $0x48] sm:$0xff] %vm1136_vm6, %v1322_v0  ;;  %v3028_v3 = vmax.f32 %v3023_v59, %v845_v47  ;;  %972 = vperm.xlu0 %2049, %v3016_v33   ;;  %v1256_v47 = vld [vmem:[#allocation5 + $0x38] sm:$0xff] }
 0x1cd   : > { %1159 = vst.msk [vmem:[#allocation2 + $0x30] sm:$0xff] %vm1136_vm6, %v3028_v3  ;;  %992 = vperm.xlu1 %2050, %v3028_v3  }
 0x1cf   : > { %v1286_v16 = vpop.xlane.xlu2 %1285 }
 0x1d0   : > { %v1315_v53 = vadd.f32 %v1286_v16, %v1251_v10  ;;  %v1294_v20 = vpop.xlane.xlu1 %1293 }
 0x1d1   : > { %v1319_v25 = vadd.f32 %v1294_v20, %v1255_v13  ;;  %v1252_v13 = vld [vmem:[#allocation5 + $0x18] sm:$0xff] }
 0x1d2   : > { %1331 = vst.msk [vmem:[#allocation5 + $0x10] sm:$0xff] %vm1136_vm6, %v1315_v53  ;;  %v1302_v49 = vpop.xlane.xlu0 %1301 }
 0x1d3   : > { %1335 = vst.msk [vmem:[#allocation5 + $0x30] sm:$0xff] %vm1136_vm6, %v1319_v25  ;;  %v1323_v42 = vadd.f32 %v1302_v49, %v1259_v23  ;;  %v3060_v23 = vld [vmem:[#allocation2 + $0x18] sm:$0xff] }
 0x1d4   : > { %v3062_v25 = vld [vmem:[#allocation2 + $0x38] sm:$0xff] }
 0x1d5   : > { %1339 = vst.msk [vmem:[#allocation5 + $0x50] sm:$0xff] %vm1136_vm6, %v1323_v42 }
 0x1d7   : > { %v861_v45 = vpop.xlane.xlu2 %860 }
 0x1d8   : > { %v3044_v1 = vmax.f32 %v3039_v54, %v861_v45  ;;  %v853_v0 = vpop.xlane.xlu1 %852 }
 0x1d9   : > { %v3047_v10 = vmax.f32 %v3041_v34, %v853_v0  ;;  %v3067_v0 = vld [vmem:[#allocation2 + $0x78] sm:$0xff] }
 0x1da   : > { %1167 = vst.msk [vmem:[#allocation2 + $0x70] sm:$0xff] %vm1136_vm6, %v3044_v1  ;;  %1032 = vperm.xlu2 %2051, %v3044_v1   ;;  %v1296_v16 = vpop.xlane.xlu0 %1295 }
 0x1db   : > { %1163 = vst.msk [vmem:[#allocation2 + $0x50] sm:$0xff] %vm1136_vm6, %v3047_v10  ;;  %v1320_v20 = vadd.f32 %v1296_v16, %v1256_v47  ;;  %1012 = vperm.xlu0 %2049, %v3047_v10   ;;  %v3089_v47 = vld [vmem:[#allocation2 + $0x58] sm:$0xff] }
 0x1dd   : > { %1336 = vst.msk [vmem:[#allocation5 + $0x38] sm:$0xff] %vm1136_vm6, %v1320_v20 }
 0x1df   : > { %v839_v49 = vpop.xlane.xlu2 %838 }
 0x1e0   : > { %v3065_v42 = vmax.f32 %v3060_v23, %v839_v49  ;;  %v847_v45 = vpop.xlane.xlu1 %846 }
 0x1e1   : > { %v3070_v53 = vmax.f32 %v3062_v25, %v847_v45  ;;  %v1260_v45 = vld [vmem:[#allocation5 + $0x58] sm:$0xff] }
 0x1e2   : > { %1156 = vst.msk [vmem:[#allocation2 + $0x18] sm:$0xff] %vm1136_vm6, %v3065_v42  ;;  %977 = vperm.xlu1 %2050, %v3065_v42   ;;  %v863_v16 = vpop.xlane.xlu0 %862 }
 0x1e3   : > { %1160 = vst.msk [vmem:[#allocation2 + $0x38] sm:$0xff] %vm1136_vm6, %v3070_v53  ;;  %v3082_v49 = vmax.f32 %v3067_v0, %v863_v16  ;;  %997 = vperm.xlu0 %2049, %v3070_v53  }
 0x1e5   : > { %3441 = vst [vmem:[#allocation15_spill] sm:$0xff] %v3082_v49 }
 0x1e6   : > { %1168 = vst.msk [vmem:[#allocation2 + $0x78] sm:$0xff] %vm1136_vm6, %v3082_v49 }
 0x1e7   : > { %v855_v51 = vpop.xlane.xlu2 %854 }
 0x1e8   : > { %v3092_v20 = vmax.f32 %v3089_v47, %v855_v51  ;;  %v1288_v5 = vpop.xlane.xlu1 %1287 }
 0x1e9   : > { %v1316_v31 = vadd.f32 %v1288_v5, %v1252_v13 }
 0x1ea   : > { %1164 = vst.msk [vmem:[#allocation2 + $0x58] sm:$0xff] %vm1136_vm6, %v3092_v20  ;;  %1017 = vperm.xlu2 %2051, %v3092_v20   ;;  %1037 = vperm.xlu1 %2050, %v3082_v49  }
 0x1eb   : > { %1332 = vst.msk [vmem:[#allocation5 + $0x18] sm:$0xff] %vm1136_vm6, %v1316_v31 }
 0x1ef   : > { %v1304_v22 = vpop.xlane.xlu2 %1303 }
 0x1f0   : > { %v1324_v15 = vadd.f32 %v1304_v22, %v1260_v45 }
 0x1f2   : > { %1340 = vst.msk [vmem:[#allocation5 + $0x58] sm:$0xff] %vm1136_vm6, %v1324_v15 }
 0x204   : > { %v1003_v51 = vpop.permute.xlu2 %1002 }
 0x205   : > { %v1048_v5 = vsub.f32 %v2821_v17, %v1003_v51 }
 0x207   : > { %v1072_v13 = vmul.f32 1.442695, %v1048_v5 }
 0x209   : > { %2053 = vpow2.f32 %v1072_v13 }
 0x20c   : > { %v968_v48 = vpop.permute.xlu2 %967 }
 0x20f   : > { %v2054_v16 = vpop.eup %2053 }
 0x214   : > { %v988_v8 = vpop.permute.xlu2 %987  ;;  %1104 = vadd.xlane.f32.xlu1 %v2054_v16 }
 0x215   : > { %v1045_v30 = vsub.f32 %v2841_v35, %v988_v8  ;;  %v963_v4 = vpop.permute.xlu1 %962  ;;  %v1041_v35 = vsub.f32 %v2832_v28, %v968_v48 }
 0x216   : > { %v1040_v55 = vsub.f32 %v2814_v14, %v963_v4 }
 0x217   : > { %v1066_v31 = vmul.f32 1.442695, %v1045_v30  ;;  %v1058_v14 = vmul.f32 1.442695, %v1041_v35 }
 0x218   : > { %v1056_v49 = vmul.f32 1.442695, %v1040_v55 }
 0x219   : > { %2055 = vpow2.f32 %v1066_v31 }
 0x21a   : > { %2057 = vpow2.f32 %v1056_v49 }
 0x21d   : > { %v983_v22 = vpop.permute.xlu0 %982 }
 0x21e   : > { %v1044_v15 = vsub.f32 %v2810_v57, %v983_v22 }
 0x21f   : > { %v2056_v45 = vpop.eup %2055  ;;  %v1023_v17 = vpop.permute.xlu1 %1022 }
 0x220   : > { %v2058_v51 = vpop.eup %2057  ;;  %v1064_v5 = vmul.f32 1.442695, %v1044_v15  ;;  %1098 = vadd.xlane.f32.xlu1 %v2056_v45  ;;  %v1052_v13 = vsub.f32 %v2827_v27, %v1023_v17 }
 0x221   : > { %1088 = vadd.xlane.f32.xlu0 %v2058_v51 }
 0x222   : > { %2059 = vpow2.f32 %v1064_v5  ;;  %v1080_v8 = vmul.f32 1.442695, %v1052_v13 }
 0x224   : > { %2061 = vpow2.f32 %v1080_v8 }
 0x225   : > { %2063 = vpow2.f32 %v1058_v14 }
 0x228   : > { %v2060_v30 = vpop.eup %2059 }
 0x229   : > { %1096 = vadd.xlane.f32.xlu2 %v2060_v30 }
 0x22a   : > { %v2062_v55 = vpop.eup %2061 }
 0x22b   : > { %1112 = vadd.xlane.f32.xlu0 %v2062_v55  ;;  %v2064_v4 = vpop.eup %2063 }
 0x22f   : > { %v1008_v57 = vpop.permute.xlu1 %1007 }
 0x230   : > { %v1049_v49 = vsub.f32 %v2847_v38, %v1008_v57 }
 0x231   : > { %1090 = vadd.xlane.f32.xlu2 %v2064_v4 }
 0x232   : > { %v1074_v16 = vmul.f32 1.442695, %v1049_v49 }
 0x234   : > { %2065 = vpow2.f32 %v1074_v16  ;;  %v1033_v15 = vpop.permute.xlu2 %1032 }
 0x235   : > { %v1028_v27 = vpop.permute.xlu0 %1027  ;;  %v1054_v38 = vsub.f32 %v2892_v61, %v1033_v15 }
 0x236   : > { %v1053_v31 = vsub.f32 %v2854_v43, %v1028_v27 }
 0x237   : > { %v1084_v8 = vmul.f32 1.442695, %v1054_v38  ;;  %v1279_v38 = vmul.f32 %v2776_v63, %v2892_v61  ;;  %v3444_v63 = vsub.f32 %v2929_v7, %v2932_v29  ;;  %v928_v7 = vld [vmem:[#allocation3] sm:$0xff] }
 0x238   : > { %v1082_v28 = vmul.f32 1.442695, %v1053_v31 }
 0x239   : > { %v896_v61 = vmul.f32 1.442695, %v3444_v63 }
 0x23a   : > { %v2066_v48 = vpop.eup %2065  ;;  %2067 = vpow2.f32 %v1082_v28 }
 0x23b   : > { %1106 = vadd.xlane.f32.xlu0 %v2066_v48 }
 0x23d   : > { %v973_v22 = vpop.permute.xlu0 %972 }
 0x23e   : > { %v1042_v45 = vsub.f32 %v2859_v40, %v973_v22 }
 0x23f   : > { %v993_v17 = vpop.permute.xlu1 %992 }
 0x240   : > { %v2068_v51 = vpop.eup %2067  ;;  %v1060_v5 = vmul.f32 1.442695, %v1042_v45  ;;  %v1046_v13 = vsub.f32 %v2868_v62, %v993_v17 }
 0x241   : > { %1114 = vadd.xlane.f32.xlu2 %v2068_v51 }
 0x242   : > { %2069 = vpow2.f32 %v1060_v5  ;;  %v1068_v35 = vmul.f32 1.442695, %v1046_v13  ;;  %v1280_v13 = vmul.f32 %v2804_v9, %v2909_v58 }
 0x244   : > { %2071 = vpow2.f32 %v1068_v35  ;;  %v1018_v14 = vpop.permute.xlu2 %1017  ;;  %v1278_v35 = vmul.f32 %v2801_v6, %v2854_v43  ;;  %v3445_v6 = vsub.f32 %v2942_v37, %v2950_v21  ;;  %v3447_v37 = vsub.f32 %v2970_v50, %v2973_v56 }
 0x245   : > { %v1051_v55 = vsub.f32 %v2917_v19, %v1018_v14  ;;  %2073 = vpow2.f32 %v1084_v8  ;;  %v3442_v8 = vsub.f32 %v2940_v32, %v2945_v11  ;;  %v933_v11 = vld [vmem:[#allocation3 + $0x28] sm:$0xff]  ;;  %v3448_v50 = vsub.f32 %v2987_v12, %v2996_v39 }
 0x246   : > { %v904_v43 = vmul.f32 1.442695, %v3445_v6  ;;  %v898_v21 = vmul.f32 1.442695, %v3447_v37  ;;  %v3450_v12 = vsub.f32 %v3005_v60, %v3016_v33  ;;  %v3452_v6 = vsub.f32 %v3039_v54, %v3044_v1 }
 0x247   : > { %v1078_v40 = vmul.f32 1.442695, %v1051_v55  ;;  %v912_v14 = vmul.f32 1.442695, %v3442_v8  ;;  %v914_v56 = vmul.f32 1.442695, %v3448_v50 }
 0x248   : > { %v2070_v30 = vpop.eup %2069  ;;  %v900_v39 = vmul.f32 1.442695, %v3450_v12  ;;  %v924_v60 = vmul.f32 1.442695, %v3452_v6  ;;  %v935_v50 = vld [vmem:[#allocation3 + $0x38] sm:$0xff] }
 0x249   : > { %1092 = vadd.xlane.f32.xlu1 %v2070_v30  ;;  %2075 = vpow2.f32 %v1078_v40  ;;  %v3443_v30 = vsub.f32 %v2982_v2, %v2985_v26  ;;  %v3446_v2 = vsub.f32 %v2947_v41, %v2962_v46  ;;  %v932_v41 = vld [vmem:[#allocation3 + $0x20] sm:$0xff] }
 0x24a   : > { %v2072_v57 = vpop.eup %2071 }
 0x24b   : > { %1100 = vadd.xlane.f32.xlu0 %v2072_v57  ;;  %v2074_v62 = vpop.eup %2073  ;;  %v906_v55 = vmul.f32 1.442695, %v3443_v30  ;;  %v920_v26 = vmul.f32 1.442695, %v3446_v2 }
 0x24d   : > { %v1013_v4 = vpop.permute.xlu0 %1012 }
 0x24e   : > { %v1050_v49 = vsub.f32 %v2875_v52, %v1013_v4 }
 0x24f   : > { %v2076_v19 = vpop.eup %2075 }
 0x250   : > { %v1076_v16 = vmul.f32 1.442695, %v1050_v49 }
 0x251   : > { %1116 = vadd.xlane.f32.xlu1 %v2074_v62 }
 0x252   : > { %2077 = vpow2.f32 %v1076_v16 }
 0x254   : > { %v978_v27 = vpop.permute.xlu1 %977 }
 0x255   : > { %v1043_v31 = vsub.f32 %v2903_v44, %v978_v27  ;;  %v998_v28 = vpop.permute.xlu0 %997 }
 0x256   : > { %v1047_v48 = vsub.f32 %v2887_v36, %v998_v28 }
 0x257   : > { %v1062_v22 = vmul.f32 1.442695, %v1043_v31 }
 0x258   : > { %v2078_v15 = vpop.eup %2077  ;;  %v1070_v45 = vmul.f32 1.442695, %v1047_v48 }
 0x259   : > { %2079 = vpow2.f32 %v1062_v22  ;;  %1108 = vadd.xlane.f32.xlu2 %v2078_v15  ;;  %1110 = vadd.xlane.f32.xlu1 %v2076_v19  ;;  %v940_v19 = vld [vmem:[#allocation3 + $0x60] sm:$0xff] }
 0x25a   : > { %2081 = vpow2.f32 %v1070_v45 }
 0x25c   : > { %v1038_v52 = vpop.permute.xlu1 %1037 }
 0x25d   : > { %v1055_v17 = vsub.f32 %v2909_v58, %v1038_v52  ;;  %v936_v58 = vld [vmem:[#allocation3 + $0x40] sm:$0xff] }
 0x25f   : > { %v2080_v51 = vpop.eup %2079  ;;  %v1086_v5 = vmul.f32 1.442695, %v1055_v17 }
 0x260   : > { %v2082_v44 = vpop.eup %2081  ;;  %1094 = vadd.xlane.f32.xlu0 %v2080_v51 }
 0x261   : > { %2083 = vpow2.f32 %v1086_v5  ;;  %1102 = vadd.xlane.f32.xlu2 %v2082_v44  ;;  %1311 = vadd.xlane.f32.xlu1 %v1280_v13  ;;  %v929_v13 = vld [vmem:[#allocation3 + $0x8] sm:$0xff] }
 0x262   : > { %2085 = vpow2.f32 %v912_v14 }
 0x263   : > { %2087 = vpow2.f32 %v906_v55 }
 0x264   : > { %2089 = vpow2.f32 %v896_v61  ;;  %v3451_v61 = vsub.f32 %v3023_v59, %v3028_v3  ;;  %v934_v59 = vld [vmem:[#allocation3 + $0x30] sm:$0xff] }
 0x265   : > { %2091 = vpow2.f32 %v904_v43  ;;  %v930_v43 = vld [vmem:[#allocation3 + $0x10] sm:$0xff] }
 0x266   : > { %2093 = vpow2.f32 %v920_v26 }
 0x267   : > { %v2084_v36 = vpop.eup %2083  ;;  %2095 = vpow2.f32 %v898_v21 }
 0x268   : > { %1118 = vadd.xlane.f32.xlu0 %v2084_v36  ;;  %v2086_v9 = vpop.eup %2085  ;;  %2097 = vpow2.f32 %v914_v56 }
 0x269   : > { %1309 = vadd.xlane.f32.xlu2 %v1279_v38  ;;  %v952_v57 = vmul.f32 %v2086_v9, %v936_v58  ;;  %v2088_v32 = vpop.eup %2087  ;;  %v937_v9 = vld [vmem:[#allocation3 + $0x48] sm:$0xff] }
 0x26a   : > { %v2090_v49 = vpop.eup %2089  ;;  %v949_v29 = vmul.f32 %v2088_v32, %v933_v11 }
 0x26b   : > { %v944_v16 = vmul.f32 %v2090_v49, %v928_v7  ;;  %v2092_v48 = vpop.eup %2091  ;;  %v3453_v49 = vsub.f32 %v3041_v34, %v3047_v10  ;;  %v3455_v34 = vsub.f32 %v3060_v23, %v3065_v42  ;;  %v3457_v23 = vld [vmem:[#allocation15_spill] sm:$0xff] }
 0x26c   : > { %v2094_v46 = vpop.eup %2093  ;;  %v948_v22 = vmul.f32 %v2092_v48, %v932_v41  ;;  %v938_v41 = vld [vmem:[#allocation3 + $0x50] sm:$0xff]  ;;  %v3458_v42 = vsub.f32 %v3067_v0, %v3457_v23 }
 0x26d   : > { %v956_v52 = vmul.f32 %v2094_v46, %v940_v19  ;;  %v2096_v5 = vpop.eup %2095  ;;  %v916_v2 = vmul.f32 1.442695, %v3453_v49  ;;  %v902_v10 = vmul.f32 1.442695, %v3455_v34  ;;  %v939_v46 = vld [vmem:[#allocation3 + $0x58] sm:$0xff] }
 0x26e   : > { %v945_v44 = vmul.f32 %v2096_v5, %v929_v13  ;;  %v2098_v14 = vpop.eup %2097  ;;  %v1264_v13 = vld [vmem:[#allocation5 + $0x78] sm:$0xff] }
 0x26f   : > { %v953_v58 = vmul.f32 %v2098_v14, %v937_v9 }
 0x270   : > { %1307 = vadd.xlane.f32.xlu0 %v1278_v35  ;;  %v3449_v35 = vsub.f32 %v3003_v18, %v3008_v24 }
 0x272   : > { %v922_v8 = vmul.f32 1.442695, %v3449_v35 }
 0x274   : > { %2099 = vpow2.f32 %v922_v8 }
 0x275   : > { %2101 = vpow2.f32 %v900_v39  ;;  %v1263_v39 = vld [vmem:[#allocation5 + $0x70] sm:$0xff] }
 0x27a   : > { %v2100_v63 = vpop.eup %2099 }
 0x27b   : > { %v2102_v33 = vpop.eup %2101 }
 0x27c   : > { %v946_v3 = vmul.f32 %v2102_v33, %v930_v43 }
 0x287   : > { %v1105_v40 = vpop.xlane.xlu1 %1104 }
 0x288   : > { %v1128_v4 = vadd.f32 %v1105_v40, %v952_v57  ;;  %v908_v57 = vmul.f32 1.442695, %v3451_v61  ;;  %v941_v40 = vld [vmem:[#allocation3 + $0x68] sm:$0xff] }
 0x289   : > { %v957_v18 = vmul.f32 %v2100_v63, %v941_v40 }
 0x28a   : > { %1145 = vst.msk [vmem:[#allocation3 + $0x40] sm:$0xff] %vm1136_vm6, %v1128_v4  ;;  %2103 = vpow2.f32 %v908_v57  ;;  %v1262_v57 = vld [vmem:[#allocation5 + $0x68] sm:$0xff] }
 0x28b   : > { %2105 = vpow2.f32 %v924_v60 }
 0x28c   : > { %2107 = vpow2.f32 %v916_v2 }
 0x290   : > { %v2104_v32 = vpop.eup %2103 }
 0x291   : > { %v950_v7 = vmul.f32 %v2104_v32, %v934_v59 }
 0x293   : > { %v1099_v62 = vpop.xlane.xlu1 %1098 }
 0x294   : > { %v1125_v27 = vadd.f32 %v1099_v62, %v949_v29  ;;  %v1089_v31 = vpop.xlane.xlu0 %1088  ;;  %v3454_v29 = vsub.f32 %v3089_v47, %v3092_v20  ;;  %v3456_v47 = vsub.f32 %v3062_v25, %v3070_v53  ;;  %v931_v25 = vld [vmem:[#allocation3 + $0x18] sm:$0xff] }
 0x295   : > { %v1120_v28 = vadd.f32 %v1089_v31, %v944_v16  ;;  %v2106_v16 = vpop.eup %2105 }
 0x296   : > { %1142 = vst.msk [vmem:[#allocation3 + $0x28] sm:$0xff] %vm1136_vm6, %v1125_v27  ;;  %v918_v54 = vmul.f32 1.442695, %v3454_v29  ;;  %v942_v27 = vld [vmem:[#allocation3 + $0x70] sm:$0xff]  ;;  %v910_v20 = vmul.f32 1.442695, %v3456_v47  ;;  %v2108_v21 = vpop.eup %2107 }
 0x297   : > { %1137 = vst.msk [vmem:[#allocation3] sm:$0xff] %vm1136_vm6, %v1120_v28  ;;  %v958_v31 = vmul.f32 %v2106_v16, %v942_v27  ;;  %v954_v19 = vmul.f32 %v2108_v21, %v938_v41 }
 0x298   : > { %2109 = vpow2.f32 %v918_v54 }
 0x299   : > { %2111 = vpow2.f32 %v902_v10 }
 0x29a   : > { %2113 = vpow2.f32 %v910_v20 }
 0x29c   : > { %v1097_v15 = vpop.xlane.xlu2 %1096 }
 0x29d   : > { %v1124_v45 = vadd.f32 %v1097_v15, %v948_v22 }
 0x29e   : > { %v1113_v17 = vpop.xlane.xlu0 %1112  ;;  %v2110_v48 = vpop.eup %2109 }
 0x29f   : > { %1141 = vst.msk [vmem:[#allocation3 + $0x20] sm:$0xff] %vm1136_vm6, %v1124_v45  ;;  %v1132_v51 = vadd.f32 %v1113_v17, %v956_v52  ;;  %v955_v22 = vmul.f32 %v2110_v48, %v939_v46  ;;  %v926_v52 = vmul.f32 1.442695, %v3458_v42  ;;  %v2112_v53 = vpop.eup %2111 }
 0x2a0   : > { %v2114_v5 = vpop.eup %2113  ;;  %v947_v56 = vmul.f32 %v2112_v53, %v931_v25 }
 0x2a1   : > { %1149 = vst.msk [vmem:[#allocation3 + $0x60] sm:$0xff] %vm1136_vm6, %v1132_v51  ;;  %2115 = vpow2.f32 %v926_v52 }
 0x2a4   : > { %v1091_v36 = vpop.xlane.xlu2 %1090 }
 0x2a5   : > { %v1121_v38 = vadd.f32 %v1091_v36, %v945_v44  ;;  %v951_v36 = vmul.f32 %v2114_v5, %v935_v50 }
 0x2a7   : > { %1138 = vst.msk [vmem:[#allocation3 + $0x8] sm:$0xff] %vm1136_vm6, %v1121_v38  ;;  %v2116_v9 = vpop.eup %2115 }
 0x2ae   : > { %v1107_v30 = vpop.xlane.xlu0 %1106 }
 0x2af   : > { %v1129_v55 = vadd.f32 %v1107_v30, %v953_v58  ;;  %v943_v58 = vld [vmem:[#allocation3 + $0x78] sm:$0xff] }
 0x2b0   : > { %v959_v12 = vmul.f32 %v2116_v9, %v943_v58 }
 0x2b1   : > { %1146 = vst.msk [vmem:[#allocation3 + $0x48] sm:$0xff] %vm1136_vm6, %v1129_v55 }
 0x2b4   : > { %v1115_v24 = vpop.xlane.xlu2 %1114 }
 0x2b5   : > { %v1133_v4 = vadd.f32 %v1115_v24, %v957_v18 }
 0x2b7   : > { %1150 = vst.msk [vmem:[#allocation3 + $0x68] sm:$0xff] %vm1136_vm6, %v1133_v4 }
 0x2bc   : > { %v1093_v11 = vpop.xlane.xlu1 %1092 }
 0x2bd   : > { %v1122_v26 = vadd.f32 %v1093_v11, %v946_v3 }
 0x2be   : > { %v1101_v1 = vpop.xlane.xlu0 %1100 }
 0x2bf   : > { %1139 = vst.msk [vmem:[#allocation3 + $0x10] sm:$0xff] %vm1136_vm6, %v1122_v26  ;;  %v1126_v62 = vadd.f32 %v1101_v1, %v950_v7 }
 0x2c1   : > { %1143 = vst.msk [vmem:[#allocation3 + $0x30] sm:$0xff] %vm1136_vm6, %v1126_v62 }
 0x2c4   : > { %v1117_v28 = vpop.xlane.xlu1 %1116 }
 0x2c5   : > { %v1134_v37 = vadd.f32 %v1117_v28, %v958_v31 }
 0x2c7   : > { %1151 = vst.msk [vmem:[#allocation3 + $0x70] sm:$0xff] %vm1136_vm6, %v1134_v37 }
 0x2cc   : > { %v1109_v15 = vpop.xlane.xlu2 %1108  ;;  %v1111_v45 = vpop.xlane.xlu1 %1110 }
 0x2cd   : > { %v1130_v17 = vadd.f32 %v1109_v15, %v954_v19  ;;  %v1131_v51 = vadd.f32 %v1111_v45, %v955_v22 }
 0x2cf   : > { %1147 = vst.msk [vmem:[#allocation3 + $0x50] sm:$0xff] %vm1136_vm6, %v1130_v17 }
 0x2d0   : > { %1148 = vst.msk [vmem:[#allocation3 + $0x58] sm:$0xff] %vm1136_vm6, %v1131_v51 }
 0x2d3   : > { %v1095_v44 = vpop.xlane.xlu0 %1094 }
 0x2d4   : > { %v1123_v38 = vadd.f32 %v1095_v44, %v947_v56  ;;  %v1103_v35 = vpop.xlane.xlu2 %1102  ;;  %v1312_v8 = vpop.xlane.xlu1 %1311 }
 0x2d5   : > { %v1127_v0 = vadd.f32 %v1103_v35, %v951_v36  ;;  %v1328_v14 = vadd.f32 %v1312_v8, %v1264_v13 }
 0x2d6   : > { %1140 = vst.msk [vmem:[#allocation3 + $0x18] sm:$0xff] %vm1136_vm6, %v1123_v38 }
 0x2d7   : > { %1144 = vst.msk [vmem:[#allocation3 + $0x38] sm:$0xff] %vm1136_vm6, %v1127_v0 }
 0x2d8   : > { %1344 = vst.msk [vmem:[#allocation5 + $0x78] sm:$0xff] %vm1136_vm6, %v1328_v14 }
 0x2db   : > { %v1119_v30 = vpop.xlane.xlu0 %1118 }
 0x2dc   : > { %v1135_v55 = vadd.f32 %v1119_v30, %v959_v12  ;;  %v1310_v63 = vpop.xlane.xlu2 %1309 }
 0x2dd   : > { %v1327_v61 = vadd.f32 %v1310_v63, %v1263_v39 }
 0x2de   : > { %1152 = vst.msk [vmem:[#allocation3 + $0x78] sm:$0xff] %vm1136_vm6, %v1135_v55 }
 0x2df   : > { %1343 = vst.msk [vmem:[#allocation5 + $0x70] sm:$0xff] %vm1136_vm6, %v1327_v61 }
 0x2e2   : > { %1348 = sbr.rel (%p1924_p2) target bundleno = 925 (0x39d), region = 48 }
 0x2e3   : > { %v1308_v40 = vpop.xlane.xlu0 %1307 }
 0x2e4   : > { %v1326_v18 = vadd.f32 %v1308_v40, %v1262_v57 }
 0x2e6   : > { %1342 = vst.msk [vmem:[#allocation5 + $0x68] sm:$0xff] %vm1136_vm6, %v1326_v18 }
 0x2e7   : > { %v1369_v24 = vld [vmem:[#allocation3 + $0x20] sm:$0xff]  ;;  %v2284_v4 = vmov 0   ;;  %v1367_v6 = vld [vmem:[#allocation3 + $0x10] sm:$0xff]  ;;  %v1370_v32 = vld [vmem:[#allocation3 + $0x28] sm:$0xff] }
 0x2e8   : > { %2119 = vset.pattern.permute.xlu2 %v2284_v4  ;;  %2118 = vset.pattern.permute.xlu1 %v2284_v4  ;;  %2120 = vlog2.f32 %v1369_v24  ;;  %v3192_v60 = vld [vmem:[#allocation4 + $0x20] sm:$0xff]  ;;  %v3194_v43 = vld [vmem:[#allocation4 + $0x10] sm:$0xff]  ;;  %v1368_v49 = vld [vmem:[#allocation3 + $0x18] sm:$0xff] }
 0x2e9   : > { %2117 = vset.pattern.permute.xlu0 %v2284_v4  ;;  %2122 = vlog2.f32 %v1367_v6  ;;  %v1365_v33 = vld [vmem:[#allocation3] sm:$0xff]  ;;  %v1366_v26 = vld [vmem:[#allocation3 + $0x8] sm:$0xff]  ;;  %v1351_v29 = vld [vmem:[#allocation2 + $0x10] sm:$0xff]  ;;  %vm1545_vm10 = vcmp.gt.f32.partialorder %v3192_v60, 0.0  ;;  %vm1543_vm12 = vcmp.gt.f32.partialorder %v3194_v43, 0.0 }
 0x2ea   : > { %2124 = vlog2.f32 %v1365_v33  ;;  %v1353_v3 = vld [vmem:[#allocation2 + $0x20] sm:$0xff]  ;;  %v3200_v54 = vld [vmem:[#allocation4 + $0x28] sm:$0xff]  ;;  %v3205_v20 = vld [vmem:[#allocation4 + $0x18] sm:$0xff] }
 0x2eb   : > { %2126 = vrcp.f32 %v3192_v60  ;;  %v3197_v11 = vld [vmem:[#allocation4] sm:$0xff]  ;;  %v1463_v41 = vld [vmem:[#allocation5 + $0x10] sm:$0xff]  ;;  %v1354_v46 = vld [vmem:[#allocation2 + $0x28] sm:$0xff]  ;;  %vm1546_vm7 = vcmp.gt.f32.partialorder %v3200_v54, 0.0  ;;  %vm1544_vm15 = vcmp.gt.f32.partialorder %v3205_v20, 0.0 }
 0x2ec   : > { %2128 = vlog2.f32 %v1370_v32  ;;  %v1373_v16 = vld [vmem:[#allocation3 + $0x40] sm:$0xff]  ;;  %v1372_v42 = vld [vmem:[#allocation3 + $0x38] sm:$0xff]  ;;  %v1447_v17 = vld [vmem:[%s2406_s10 + $0x10] sm:$0xff]  ;;  %vm1541_vm1 = vcmp.gt.f32.partialorder %v3197_v11, 0.0 }
 0x2ed   : > { %2130 = vrcp.f32 %v3194_v43  ;;  %v1465_v31 = vld [vmem:[#allocation5 + $0x20] sm:$0xff]  ;;  %v1352_v13 = vld [vmem:[#allocation2 + $0x18] sm:$0xff]  ;;  %v3213_v44 = vld [vmem:[#allocation4 + $0x8] sm:$0xff] }
 0x2ee   : > { %v2121_v59 = vpop.eup %2120  ;;  %2132 = vlog2.f32 %v1368_v49  ;;  %v1349_v28 = vld [vmem:[#allocation2] sm:$0xff]  ;;  %v1466_v35 = vld [vmem:[#allocation5 + $0x28] sm:$0xff]  ;;  %v1371_v30 = vld [vmem:[#allocation3 + $0x30] sm:$0xff]  ;;  %vm1542_vm13 = vcmp.gt.f32.partialorder %v3213_v44, 0.0 }
 0x2ef   : > { %v1390_v2 = vmul.f32 0.6931472, %v2121_v59  ;;  %v2123_v7 = vpop.eup %2122  ;;  %2134 = vrcp.f32 %v3197_v11  ;;  %v1449_v48 = vld [vmem:[%s2406_s10 + $0x20] sm:$0xff]  ;;  %v1350_v39 = vld [vmem:[#allocation2 + $0x8] sm:$0xff]  ;;  %v1464_v6 = vld [vmem:[#allocation5 + $0x18] sm:$0xff] }
 0x2f0   : > { %v1386_v62 = vmul.f32 0.6931472, %v2123_v7  ;;  %v2125_v27 = vpop.eup %2124  ;;  %2136 = vlog2.f32 %v1366_v26  ;;  %v1461_v51 = vld [vmem:[#allocation5] sm:$0xff]  ;;  %v1450_v63 = vld [vmem:[%s2406_s10 + $0x28] sm:$0xff] }
 0x2f1   : > { %v1417_v1 = vadd.f32 %v1390_v2, %v1353_v3  ;;  %v2127_v34 = vpop.eup %2126  ;;  %v1382_v47 = vmul.f32 0.6931472, %v2125_v27  ;;  %2138 = vrcp.f32 %v3200_v54  ;;  %v1445_v38 = vld [vmem:[%s2406_s10] sm:$0xff]  ;;  %v1376_v27 = vld [vmem:[#allocation3 + $0x58] sm:$0xff] }
 0x2f2   : > { %v1415_v37 = vadd.f32 %v1386_v62, %v1351_v29  ;;  %v2129_v21 = vpop.eup %2128  ;;  %2140 = vlog2.f32 %v1373_v16  ;;  %v1357_v33 = vld [vmem:[#allocation2 + $0x40] sm:$0xff]  ;;  %v1448_v62 = vld [vmem:[%s2406_s10 + $0x18] sm:$0xff]  ;;  %v1462_v16 = vld [vmem:[#allocation5 + $0x8] sm:$0xff] }
 0x2f3   : > { %v1481_v10 = vmul.f32 %v3192_v60, %v1417_v1  ;;  %v2131_v19 = vpop.eup %2130  ;;  %v1413_v45 = vadd.f32 %v1382_v47, %v1349_v28  ;;  %v1392_v23 = vmul.f32 0.6931472, %v2129_v21  ;;  %2142 = vrcp.f32 %v3205_v20  ;;  %v3223_v32 = vld [vmem:[#allocation4 + $0x40] sm:$0xff]  ;;  %v1356_v47 = vld [vmem:[#allocation2 + $0x38] sm:$0xff] }
 0x2f4   : > { %v1479_v15 = vmul.f32 %v3194_v43, %v1415_v37  ;;  %v2133_v52 = vpop.eup %2132  ;;  %2144 = vlog2.f32 %v1372_v42  ;;  %v3233_v60 = vld [vmem:[#allocation4 + $0x38] sm:$0xff]  ;;  %vm1549_vm4 = vcmp.gt.f32.partialorder %v3223_v32, 0.0 }
 0x2f5   : > { %v1497_v22 = vsub.f32 %v1465_v31, %v1481_v10  ;;  %v2135_v53 = vpop.eup %2134  ;;  %v1477_v50 = vmul.f32 %v3197_v11, %v1413_v45  ;;  %v1418_v56 = vadd.f32 %v1392_v23, %v1354_v46  ;;  %v1388_v8 = vmul.f32 0.6931472, %v2133_v52  ;;  %v1469_v46 = vld [vmem:[#allocation5 + $0x40] sm:$0xff]  ;;  %v3238_v52 = vld [vmem:[#allocation4 + $0x30] sm:$0xff] }
 0x2f6   : > { %v1495_v5 = vsub.f32 %v1463_v41, %v1479_v15  ;;  %v2137_v36 = vpop.eup %2136  ;;  %2146 = vrcp.f32 %v3213_v44  ;;  %vm1548_vm3 = vcmp.gt.f32.partialorder %v3233_v60, 0.0  ;;  %vm1547_vm5 = vcmp.gt.f32.partialorder %v3238_v52, 0.0 }
 0x2f7   : > { %v1513_v25 = vmul.f32 %v1497_v22, %v1449_v48  ;;  %v2139_v0 = vpop.eup %2138  ;;  %v1493_v58 = vsub.f32 %v1461_v51, %v1477_v50  ;;  %v1482_v12 = vmul.f32 %v3200_v54, %v1418_v56  ;;  %v1416_v61 = vadd.f32 %v1388_v8, %v1352_v13  ;;  %v1375_v22 = vld [vmem:[#allocation3 + $0x50] sm:$0xff]  ;;  %v1453_v51 = vld [vmem:[%s2406_s10 + $0x40] sm:$0xff]  ;;  %v1378_v54 = vld [vmem:[#allocation3 + $0x68] sm:$0xff] }
 0x2f8   : > { %v1511_v9 = vmul.f32 %v1495_v5, %v1447_v17  ;;  %v2141_v55 = vpop.eup %2140  ;;  %v1384_v57 = vmul.f32 0.6931472, %v2137_v36  ;;  %2148 = vlog2.f32 %v1371_v30  ;;  %v1468_v36 = vld [vmem:[#allocation5 + $0x38] sm:$0xff] }
 0x2f9   : > { %v1561_v14 = vsub.f32 0.0, %v1513_v25  ;;  %v1509_v24 = vmul.f32 %v1493_v58, %v1445_v38  ;;  %v1498_v4 = vsub.f32 %v1466_v35, %v1482_v12  ;;  %v2143_v59 = vpop.eup %2142  ;;  %v1480_v3 = vmul.f32 %v3205_v20, %v1416_v61  ;;  %v1355_v38 = vld [vmem:[#allocation2 + $0x30] sm:$0xff]  ;;  %v3244_v35 = vld [vmem:[#allocation4 + $0x58] sm:$0xff] }
 0x2fa   : > { %v1559_v18 = vsub.f32 0.0, %v1511_v9  ;;  %v1414_v49 = vadd.f32 %v1384_v57, %v1350_v39  ;;  %v1398_v2 = vmul.f32 0.6931472, %v2141_v55  ;;  %v2145_v31 = vpop.eup %2144  ;;  %2150 = vrcp.f32 %v3223_v32  ;;  %v1452_v30 = vld [vmem:[%s2406_s10 + $0x38] sm:$0xff]  ;;  %v3251_v55 = vld [vmem:[#allocation4 + $0x50] sm:$0xff] }
 0x2fb   : > { %v1577_v40 = vmul.f32 %v2127_v34, %v1561_v14  ;;  %v1557_v29 = vsub.f32 0.0, %v1509_v24  ;;  %v1514_v1 = vmul.f32 %v1498_v4, %v1450_v63  ;;  %v1496_v28 = vsub.f32 %v1464_v6, %v1480_v3  ;;  %v1446_v34 = vld [vmem:[%s2406_s10 + $0x8] sm:$0xff]  ;;  %v1379_v14 = vld [vmem:[#allocation3 + $0x70] sm:$0xff]  ;;  %v1360_v6 = vld [vmem:[#allocation2 + $0x58] sm:$0xff] }
 0x2fc   : > { %v1575_v7 = vmul.f32 %v2131_v19, %v1559_v18  ;;  %v1478_v10 = vmul.f32 %v3213_v44, %v1414_v49  ;;  %v1421_v37 = vadd.f32 %v1398_v2, %v1357_v33  ;;  %v1396_v19 = vmul.f32 0.6931472, %v2145_v31  ;;  %v2147_v15 = vpop.eup %2146  ;;  %v1467_v4 = vld [vmem:[#allocation5 + $0x30] sm:$0xff]  ;;  %v3259_v2 = vld [vmem:[#allocation4 + $0x48] sm:$0xff]  ;;  %v1472_v44 = vld [vmem:[#allocation5 + $0x58] sm:$0xff] }
 0x2fd   : > { %v1593_v26 = vsel %vm1545_vm10, %v1577_v40, 0.0  ;;  %v1573_v48 = vmul.f32 %v2135_v53, %v1557_v29  ;;  %v1562_v41 = vsub.f32 0.0, %v1514_v1  ;;  %v1512_v45 = vmul.f32 %v1496_v28, %v1448_v62  ;;  %v1374_v53 = vld [vmem:[#allocation3 + $0x48] sm:$0xff]  ;;  %v1451_v29 = vld [vmem:[%s2406_s10 + $0x30] sm:$0xff] }
 0x2fe   : > { %1627 = vperm.xlu2 %2119, %v1593_v26   ;;  %v1591_v21 = vsel %vm1543_vm12, %v1575_v7, 0.0  ;;  %v1494_v23 = vsub.f32 %v1462_v16, %v1478_v10  ;;  %v1485_v42 = vmul.f32 %v3223_v32, %v1421_v37  ;;  %2152 = vlog2.f32 %v1376_v27  ;;  %v2149_v5 = vpop.eup %2148  ;;  %v1359_v1 = vld [vmem:[#allocation2 + $0x50] sm:$0xff] }
 0x2ff   : > { %1617 = vperm.xlu1 %2118, %v1591_v21   ;;  %v1589_v17 = vsel %vm1541_vm1, %v1573_v48, 0.0  ;;  %v1578_v43 = vmul.f32 %v2139_v0, %v1562_v41  ;;  %v1420_v25 = vadd.f32 %v1396_v19, %v1356_v47  ;;  %2154 = vrcp.f32 %v3233_v60  ;;  %v1358_v19 = vld [vmem:[#allocation2 + $0x48] sm:$0xff] }
 0x300   : > { %1607 = vperm.xlu0 %2117, %v1589_v17   ;;  %v1560_v50 = vsub.f32 0.0, %v1512_v45  ;;  %v1510_v56 = vmul.f32 %v1494_v23, %v1446_v34  ;;  %v1501_v13 = vsub.f32 %v1469_v46, %v1485_v42  ;;  %2156 = vlog2.f32 %v1375_v22  ;;  %v2151_v9 = vpop.eup %2150  ;;  %v1377_v34 = vld [vmem:[#allocation3 + $0x60] sm:$0xff]  ;;  %v3269_v22 = vld [vmem:[#allocation4 + $0x70] sm:$0xff]  ;;  %v1456_v45 = vld [vmem:[%s2406_s10 + $0x58] sm:$0xff] }
 0x301   : > { %v1594_v11 = vsel %vm1546_vm7, %v1578_v43, 0.0  ;;  %v1484_v8 = vmul.f32 %v3233_v60, %v1420_v25  ;;  %v1394_v0 = vmul.f32 0.6931472, %v2149_v5  ;;  %2158 = vrcp.f32 %v3238_v52  ;;  %v1471_v23 = vld [vmem:[#allocation5 + $0x50] sm:$0xff]  ;;  %v1380_v5 = vld [vmem:[#allocation3 + $0x78] sm:$0xff] }
 0x302   : > { %v1576_v58 = vmul.f32 %v2143_v59, %v1560_v50  ;;  %v1558_v12 = vsub.f32 0.0, %v1510_v56  ;;  %v1517_v39 = vmul.f32 %v1501_v13, %v1453_v51  ;;  %2160 = vlog2.f32 %v1374_v53  ;;  %v1363_v53 = vld [vmem:[#allocation2 + $0x70] sm:$0xff] }
 0x303   : > { %v1500_v63 = vsub.f32 %v1468_v36, %v1484_v8  ;;  %v1419_v61 = vadd.f32 %v1394_v0, %v1355_v38  ;;  %2162 = vrcp.f32 %v3244_v35  ;;  %v1455_v56 = vld [vmem:[%s2406_s10 + $0x50] sm:$0xff]  ;;  %v1362_v38 = vld [vmem:[#allocation2 + $0x68] sm:$0xff]  ;;  %vm1552_vm6 = vcmp.gt.f32.partialorder %v3244_v35, 0.0 }
 0x304   : > { %v2153_v57 = vpop.eup %2152  ;;  %v1592_v40 = vsel %vm1544_vm15, %v1576_v58, 0.0  ;;  %v1574_v18 = vmul.f32 %v2147_v15, %v1558_v12  ;;  %v1565_v24 = vsub.f32 0.0, %v1517_v39  ;;  %2164 = vlog2.f32 %v1379_v14  ;;  %v1470_v0 = vld [vmem:[#allocation5 + $0x48] sm:$0xff] }
 0x305   : > { %v2155_v33 = vpop.eup %2154  ;;  %v1516_v59 = vmul.f32 %v1500_v63, %v1452_v30  ;;  %v1483_v3 = vmul.f32 %v3238_v52, %v1419_v61  ;;  %v1404_v49 = vmul.f32 0.6931472, %v2153_v57  ;;  %2166 = vrcp.f32 %v3251_v55  ;;  %v1475_v57 = vld [vmem:[#allocation5 + $0x70] sm:$0xff] }
 0x306   : > { %1632 = vperm.xlu2 %2119, %v1594_v11   ;;  %v2157_v26 = vpop.eup %2156  ;;  %v1590_v20 = vsel %vm1542_vm13, %v1574_v18, 0.0  ;;  %v1581_v7 = vmul.f32 %v2151_v9, %v1565_v24  ;;  %2168 = vlog2.f32 %v1378_v54  ;;  %v3278_v9 = vld [vmem:[#allocation4 + $0x68] sm:$0xff]  ;;  %vm1551_vm14 = vcmp.gt.f32.partialorder %v3251_v55, 0.0 }
 0x307   : > { %1622 = vperm.xlu1 %2118, %v1592_v40   ;;  %v2159_v62 = vpop.eup %2158  ;;  %v1564_v16 = vsub.f32 0.0, %v1516_v59  ;;  %v1499_v27 = vsub.f32 %v1467_v4, %v1483_v3  ;;  %v1424_v31 = vadd.f32 %v1404_v49, %v1360_v6  ;;  %v1402_v28 = vmul.f32 0.6931472, %v2157_v26  ;;  %v1454_v54 = vld [vmem:[%s2406_s10 + $0x48] sm:$0xff]  ;;  %v1459_v3 = vld [vmem:[%s2406_s10 + $0x70] sm:$0xff] }
 0x308   : > { %v2161_v10 = vpop.eup %2160  ;;  %1612 = vperm.xlu0 %2117, %v1590_v20   ;;  %v1597_v37 = vsel %vm1549_vm4, %v1581_v7, 0.0  ;;  %2170 = vrcp.f32 %v3259_v2  ;;  %v1474_v6 = vld [vmem:[#allocation5 + $0x68] sm:$0xff]  ;;  %v1441_v20 = vld [vmem:[#allocation4 + $0x60] sm:$0xff]  ;;  %vm1550_vm0 = vcmp.gt.f32.partialorder %v3259_v2, 0.0  ;;  %vm1555_vm9 = vcmp.gt.f32.partialorder %v3269_v22, 0.0 }
 0x309   : > { %v2163_v47 = vpop.eup %2162  ;;  %v1580_v21 = vmul.f32 %v2155_v33, %v1564_v16  ;;  %v1515_v48 = vmul.f32 %v1499_v27, %v1451_v29  ;;  %v1488_v41 = vmul.f32 %v3244_v35, %v1424_v31  ;;  %v1423_v46 = vadd.f32 %v1402_v28, %v1359_v1  ;;  %v1361_v33 = vld [vmem:[#allocation2 + $0x60] sm:$0xff] }
 0x30a   : > { %v2165_v15 = vpop.eup %2164  ;;  %v1400_v32 = vmul.f32 0.6931472, %v2161_v10  ;;  %2172 = vlog2.f32 %v1377_v34  ;;  %vm1554_vm2 = vcmp.gt.f32.partialorder %v3278_v9, 0.0  ;;  %vm1553_vm8 = vcmp.gt.f32.partialorder %v1441_v20, 0.0 }
 0x30b   : > { %v2167_v42 = vpop.eup %2166  ;;  %v1596_v17 = vsel %vm1548_vm3, %v1580_v21, 0.0  ;;  %v1563_v43 = vsub.f32 0.0, %v1515_v48  ;;  %v1504_v51 = vsub.f32 %v1472_v44, %v1488_v41  ;;  %v1487_v25 = vmul.f32 %v3251_v55, %v1423_v46  ;;  %v1473_v44 = vld [vmem:[#allocation5 + $0x60] sm:$0xff] }
 0x30c   : > { %v2169_v50 = vpop.eup %2168  ;;  %v1422_v13 = vadd.f32 %v1400_v32, %v1358_v19  ;;  %v1410_v36 = vmul.f32 0.6931472, %v2165_v15  ;;  %2174 = vrcp.f32 %v3269_v22 }
 0x30d   : > { %v1579_v11 = vmul.f32 %v2159_v62, %v1563_v43  ;;  %v1520_v60 = vmul.f32 %v1504_v51, %v1456_v45  ;;  %v1503_v8 = vsub.f32 %v1471_v23, %v1487_v25  ;;  %v1408_v14 = vmul.f32 0.6931472, %v2169_v50  ;;  %v1458_v62 = vld [vmem:[%s2406_s10 + $0x68] sm:$0xff]  ;;  %v1457_v45 = vld [vmem:[%s2406_s10 + $0x60] sm:$0xff]  ;;  %v1444_v23 = vld [vmem:[#allocation4 + $0x78] sm:$0xff] }
 0x30e   : > { %1647 = vperm.xlu2 %2119, %v1597_v37   ;;  %v2171_v58 = vpop.eup %2170  ;;  %v1486_v12 = vmul.f32 %v3259_v2, %v1422_v13  ;;  %v1427_v39 = vadd.f32 %v1410_v36, %v1363_v53  ;;  %2176 = vlog2.f32 %v1380_v5  ;;  %v1476_v51 = vld [vmem:[#allocation5 + $0x78] sm:$0xff]  ;;  %vm1556_vm11 = vcmp.gt.f32.partialorder %v1444_v23, 0.0 }
 0x30f   : > { %1642 = vperm.xlu1 %2118, %v1596_v17   ;;  %v1595_v30 = vsel %vm1547_vm5, %v1579_v11, 0.0  ;;  %v1568_v63 = vsub.f32 0.0, %v1520_v60  ;;  %v1519_v61 = vmul.f32 %v1503_v8, %v1455_v56  ;;  %v1426_v40 = vadd.f32 %v1408_v14, %v1362_v38  ;;  %v1460_v13 = vld [vmem:[%s2406_s10 + $0x78] sm:$0xff] }
 0x310   : > { %v2173_v18 = vpop.eup %2172  ;;  %1637 = vperm.xlu0 %2117, %v1595_v30   ;;  %v1502_v24 = vsub.f32 %v1470_v0, %v1486_v12  ;;  %v1491_v4 = vmul.f32 %v3269_v22, %v1427_v39  ;;  %2178 = vrcp.f32 %v3278_v9 }
 0x311   : > { %v1584_v52 = vmul.f32 %v2163_v47, %v1568_v63  ;;  %v1567_v59 = vsub.f32 0.0, %v1519_v61  ;;  %v1490_v49 = vmul.f32 %v3278_v9, %v1426_v40  ;;  %v1406_v26 = vmul.f32 0.6931472, %v2173_v18  ;;  %v1364_v47 = vld [vmem:[#allocation2 + $0x78] sm:$0xff] }
 0x312   : > { %v2175_v7 = vpop.eup %2174  ;;  %v1518_v29 = vmul.f32 %v1502_v24, %v1454_v54  ;;  %v1507_v1 = vsub.f32 %v1475_v57, %v1491_v4  ;;  %2180 = vrcp.f32 %v1441_v20 }
 0x313   : > { %v1600_v16 = vsel %vm1552_vm6, %v1584_v52, 0.0  ;;  %v1583_v27 = vmul.f32 %v2167_v42, %v1567_v59  ;;  %v1506_v31 = vsub.f32 %v1474_v6, %v1490_v49  ;;  %v1425_v28 = vadd.f32 %v1406_v26, %v1361_v33 }
 0x314   : > { %v2177_v34 = vpop.eup %2176  ;;  %v1566_v10 = vsub.f32 0.0, %v1518_v29  ;;  %v1523_v37 = vmul.f32 %v1507_v1, %v1459_v3  ;;  %2182 = vrcp.f32 %v1444_v23 }
 0x315   : > { %v1599_v21 = vsel %vm1551_vm14, %v1583_v27, 0.0  ;;  %v1522_v48 = vmul.f32 %v1506_v31, %v1458_v62  ;;  %v1489_v41 = vmul.f32 %v1441_v20, %v1425_v28  ;;  %v1412_v35 = vmul.f32 0.6931472, %v2177_v34 }
 0x316   : > { %1662 = vperm.xlu2 %2119, %v1600_v16   ;;  %v2179_v46 = vpop.eup %2178  ;;  %v1582_v19 = vmul.f32 %v2171_v58, %v1566_v10  ;;  %v1571_v15 = vsub.f32 0.0, %v1523_v37 }
 0x317   : > { %1657 = vperm.xlu1 %2118, %v1599_v21   ;;  %v1570_v32 = vsub.f32 0.0, %v1522_v48  ;;  %v1505_v42 = vsub.f32 %v1473_v44, %v1489_v41  ;;  %v1428_v17 = vadd.f32 %v1412_v35, %v1364_v47 }
 0x318   : > { %v1598_v43 = vsel %vm1550_vm0, %v1582_v19, 0.0  ;;  %v1587_v55 = vmul.f32 %v2175_v7, %v1571_v15  ;;  %v2181_v50 = vpop.eup %2180 }
 0x319   : > { %1652 = vperm.xlu0 %2117, %v1598_v43   ;;  %v1586_v25 = vmul.f32 %v2179_v46, %v1570_v32  ;;  %v1521_v53 = vmul.f32 %v1505_v42, %v1457_v45  ;;  %v1492_v5 = vmul.f32 %v1444_v23, %v1428_v17 }
 0x31a   : > { %v1603_v56 = vsel %vm1555_vm9, %v1587_v55, 0.0  ;;  %v2183_v60 = vpop.eup %2182 }
 0x31b   : > { %v1602_v36 = vsel %vm1554_vm2, %v1586_v25, 0.0  ;;  %v1569_v22 = vsub.f32 0.0, %v1521_v53  ;;  %v1508_v38 = vsub.f32 %v1476_v51, %v1492_v5 }
 0x31d   : > { %v1585_v2 = vmul.f32 %v2181_v50, %v1569_v22  ;;  %v1524_v11 = vmul.f32 %v1508_v38, %v1460_v13 }
 0x31e   : > { %1677 = vperm.xlu2 %2119, %v1603_v56  }
 0x31f   : > { %1672 = vperm.xlu1 %2118, %v1602_v36   ;;  %v1601_v8 = vsel %vm1553_vm8, %v1585_v2, 0.0  ;;  %v1572_v0 = vsub.f32 0.0, %v1524_v11 }
 0x321   : > { %1667 = vperm.xlu0 %2117, %v1601_v8   ;;  %v1588_v14 = vmul.f32 %v2183_v60, %v1572_v0 }
 0x323   : > { %v1604_v9 = vsel %vm1556_vm11, %v1588_v14, 0.0 }
 0x329   : > { %1682 = vperm.xlu0 %2117, %v1604_v9  }
 0x358   : > { %v1628_v58 = vpop.permute.xlu2 %1627 }
 0x359   : > { %1689 = vst [vmem:[%s2419_s27 + $0x20] sm:$0xff] %v1628_v58 }
 0x360   : > { %v1633_v12 = vpop.permute.xlu2 %1632 }
 0x361   : > { %1690 = vst [vmem:[%s2419_s27 + $0x28] sm:$0xff] %v1633_v12 }
 0x368   : > { %v1648_v39 = vpop.permute.xlu2 %1647 }
 0x369   : > { %1693 = vst [vmem:[%s2419_s27 + $0x40] sm:$0xff] %v1648_v39 }
 0x370   : > { %v1663_v30 = vpop.permute.xlu2 %1662 }
 0x371   : > { %1696 = vst [vmem:[%s2419_s27 + $0x58] sm:$0xff] %v1663_v30  ;;  %v1618_v63 = vpop.permute.xlu1 %1617 }
 0x372   : > { %1687 = vst [vmem:[%s2419_s27 + $0x10] sm:$0xff] %v1618_v63  ;;  %v1608_v61 = vpop.permute.xlu0 %1607 }
 0x373   : > { %1685 = vst [vmem:[%s2419_s27] sm:$0xff] %v1608_v61 }
 0x378   : > { %v1678_v54 = vpop.permute.xlu2 %1677 }
 0x379   : > { %1699 = vst [vmem:[%s2419_s27 + $0x70] sm:$0xff] %v1678_v54  ;;  %v1623_v57 = vpop.permute.xlu1 %1622 }
 0x37a   : > { %1688 = vst [vmem:[%s2419_s27 + $0x18] sm:$0xff] %v1623_v57  ;;  %v1613_v40 = vpop.permute.xlu0 %1612 }
 0x37b   : > { %1686 = vst [vmem:[%s2419_s27 + $0x8] sm:$0xff] %v1613_v40 }
 0x381   : > { %v1643_v18 = vpop.permute.xlu1 %1642 }
 0x382   : > { %1692 = vst [vmem:[%s2419_s27 + $0x38] sm:$0xff] %v1643_v18  ;;  %v1638_v24 = vpop.permute.xlu0 %1637 }
 0x383   : > { %1691 = vst [vmem:[%s2419_s27 + $0x30] sm:$0xff] %v1638_v24 }
 0x389   : > { %v1658_v4 = vpop.permute.xlu1 %1657 }
 0x38a   : > { %1695 = vst [vmem:[%s2419_s27 + $0x50] sm:$0xff] %v1658_v4 }
 0x38b   : > { %v1653_v6 = vpop.permute.xlu0 %1652 }
 0x38c   : > { %1694 = vst [vmem:[%s2419_s27 + $0x48] sm:$0xff] %v1653_v6 }
 0x391   : > { %v1673_v33 = vpop.permute.xlu1 %1672 }
 0x392   : > { %1698 = vst [vmem:[%s2419_s27 + $0x68] sm:$0xff] %v1673_v33 }
 0x393   : > { %v1668_v52 = vpop.permute.xlu0 %1667 }
 0x394   : > { %1697 = vst [vmem:[%s2419_s27 + $0x60] sm:$0xff] %v1668_v52 }
 0x39b   : > { %v1683_v59 = vpop.permute.xlu0 %1682 }
 0x39c   : > { %1700 = vst [vmem:[%s2419_s27 + $0x78] sm:$0xff] %v1683_v59 }
 0x39d PF: > { %s1713_s29 = scalar_lea.hbm %s3369_s5, %s1922_s0  ;;  %s1714_s9 = sshll.u32 %s2419_s27, 4  ;;  %s1715_s9 = int_to_ptr.vmem [resolvable:$true] %s1714_s9 }
 0x39e   : > { %s1716_s10 = sshll.u32 %s1713_s29, 4  ;;  %s3459_s12 = sand.u32 1, %s2254_s19   ;;  %s1717_s10 = int_to_ptr.hbm [resolvable:$true] %s1716_s10 }
 0x39f   : > { %s1702_s13 = scalar_lea.sflag [#allocation7], %s3459_s12  ;;  %s2198_s14 = sshra.s32 %s1717_s10, 4  ;;  %s2199_s14 = int_to_ptr.hbm [resolvable:$true] %s2198_s14 }
 0x3a0   : > { %s2200_s15 = scalar_lea.hbm %s2199_s14, 128  ;;  %s2204_s7 = scalar_lea.hbm %s3369_s5, 256 }
 0x3a1   : > { %p2201_p4 = scmp.ne.s32.totalorder %s2199_s14, %s2200_s15  ;;  %p2205_p7 = scmp.lt.s32.totalorder %s2199_s14, %s3369_s5 }
 0x3a2   : > { %p2206_p8 = scmp.lt.s32.totalorder %s2204_s7, %s2200_s15 }
 0x3a3   : > { %p2202_p5 = pnand %p2201_p4, %p2366_p3 }
 0x3a4   : > { %p2207_p10 = por %p2206_p8, %p2205_p7 }
 0x3a5   : > { %p2203_p6 = pneg %p2202_p5 }
 0x3a7   : > { %p2208_p11 = pnand %p2207_p10, %p2203_p6 }
 0x3a9   : > { %2211 = shalt.err (!%p2208_p11)
}
 0x3aa   : > { %s2285_s16 = smov 128   ;;  %s2286_s17 = smov 8  }
 0x3ab   : > { %1971 = dma.vmem_to_hbm [thread:$0]  (%p2366_p3), %s1715_s9, 2048, %s1717_s10, %s1702_s13, %s2285_s16, %s2285_s16, %s2286_s17  }
 0x3ac PF: > { %p1977_p12 = scmp.ge.s32.totalorder %s2278_s25, 2  ;;  %s1731_s27 = sand.u32 1, %s2250_s18  }
 0x3ad   : > { %s1732_s0 = scalar_lea.sflag [#allocation7], %s1731_s27 }
 0x3ae   : > { %p1974_p13 = pnand %p1977_p12, %p2376_p9 }
 0x3b0   : > { %p1975_p0 = pneg %p1974_p13 }
 0x3b2   : > { %2245 = dma.done.wait (%p1975_p0), %s1732_s0, 2048  }
 0x3b3   : > { %2247 = vsyncadd (%p1975_p0), %s1732_s0, 4294965248  ;;  %s18_s25 = sadd.s32 1, %s2278_s25   ;;  %s3460_s20 = sld [smem:[#allocation9_spill]] }
 0x3b4   : > { %p15_p1 = scmp.ge.s32.totalorder %s18_s25, 6   ;;  %s3461_s23 = sld [smem:[#allocation14_spill]] }
 0x3b5   : > { %s3462_s21 = sld [smem:[#allocation10_spill]]  ;;  %s3466_s18 = smov %s2254_s19 }
 0x3b6   : > { %s3463_s22 = sld [smem:[#allocation11_spill]] }
 0x3b7   : > { %s3464_s30 = sld [smem:[#allocation12_spill]] }
 0x3b8   : > { %s3465_s24 = sld [smem:[#allocation13_spill]] }
 0x3b9   : > { %s3467_s19 = smov %s3460_s20  ;;  %17 = sbr.rel (!%p15_p1) target bundleno = 7 (0x7), region = 95 }
 0x3ba   : > { %s3468_s20 = smov %s3461_s23 }
 0x3bd   : > { %s3469_s23 = smov %s3464_s30 }
 0x3be   :  { %1738 = vsyncpa [#allocation7], 1 }
 0x3bf   :  { %1740 = vsyncpa [#allocation7 + $0x1], 1 }

</bundles_post_ra>
